<compile_context>
chip_gen: v5e
topology: v5e:2x2
jax: 0.10.0
libtpu: 0.0.40
codegen_flags: <defaults>
</compile_context>

<pallas_src>
import functools

import jax
import jax.numpy as jnp
from jax import lax
from jax.experimental import pallas as pl
from jax.experimental.pallas import tpu as pltpu


def _round_up(x, m):
    return ((x + m - 1) // m) * m


def _spatial_attention_kernel(params_ref, x_ref, o_ref, pad_ref, *,
                              k, C, W, HW, HW_lane, Nb, c_chunk,
                              delta, istart, pad_len):
    p = (k - 1) // 2
    n_full = C // c_chunk
    rem = C - n_full * c_chunk

    # ---- Phase 1: fused channel-mean / channel-max, one pass over C --------
    acc_sum = jnp.zeros((Nb, 1, HW_lane), jnp.float32)
    run_max = jnp.full((Nb, 1, HW_lane), -jnp.inf, jnp.float32)
    if n_full > 8:
        # Many chunks: rolled loop keeps vreg pressure flat and gives the
        # scheduler visibility; modest unroll for ILP.
        def p1_body(i, carry):
            s, m = carry
            c0 = pl.multiple_of(i * c_chunk, c_chunk)
            xc = x_ref[:, pl.ds(c0, c_chunk), :].astype(jnp.float32)
            return (s + jnp.sum(xc, axis=1, keepdims=True),
                    jnp.maximum(m, jnp.max(xc, axis=1, keepdims=True)))
        acc_sum, run_max = lax.fori_loop(0, n_full, p1_body,
                                         (acc_sum, run_max), unroll=2)
        if rem:
            xc = x_ref[:, C - rem:C, :].astype(jnp.float32)
            acc_sum = acc_sum + jnp.sum(xc, axis=1, keepdims=True)
            run_max = jnp.maximum(run_max, jnp.max(xc, axis=1, keepdims=True))
    else:
        for c0 in range(0, C, c_chunk):
            c1 = min(C, c0 + c_chunk)
            xc = x_ref[:, c0:c1, :].astype(jnp.float32)
            acc_sum = acc_sum + jnp.sum(xc, axis=1, keepdims=True)
            run_max = jnp.maximum(run_max, jnp.max(xc, axis=1, keepdims=True))
    avg = acc_sum * jnp.float32(1.0 / C)

    # ---- Phase 2: write zero-padded maps into the VMEM scratch -------------
    # pad_ref[b, c, istart + r*W + j] = map_c(r, j); zero in the halo strips.
    # Only the halos are zeroed (the interior is fully overwritten below).
    if istart > 0:
        pad_ref[:, :, 0:istart] = jnp.zeros((Nb, 2, istart), jnp.float32)
    if pad_len > istart + HW:
        pad_ref[:, :, istart + HW:pad_len] = jnp.zeros(
            (Nb, 2, pad_len - istart - HW), jnp.float32)
    pad_ref[:, 0:1, istart:istart + HW] = avg[:, :, :HW]      # lane-aligned
    pad_ref[:, 1:2, istart:istart + HW] = run_max[:, :, :HW]  # (istart % 128 == 0)

    # ---- Phase 3: k*k "same" conv taps (VPU, lane-dense flat layout) -------
    # Tap (u, v): value for flat output q is pad[delta + q + u*W + v]; valid
    # only when the column j = q % W satisfies 0 <= j + v - p < W (no wrap).
    col = lax.broadcasted_iota(jnp.int32, (1, 1, HW_lane), 2) % W
    col_masks = []
    for v in range(k):
        lo = p - v
        col_masks.append((col >= lo) & (col < W + lo))        # (1, 1, HW_lane)

    conv = jnp.full((Nb, 1, HW_lane), params_ref[2 * k * k], dtype=jnp.float32)
    for v in range(k):
        # Accumulate the k row taps for this column offset, then mask once.
        col_acc = None
        for u in range(k):
            s = delta + u * W + v
            tap = pad_ref[:, :, s:s + HW_lane]                # (Nb, 2, HW_lane)
            w_avg = params_ref[u * k + v]
            w_max = params_ref[k * k + u * k + v]
            contrib = w_avg * tap[:, 0:1, :] + w_max * tap[:, 1:2, :]
            col_acc = contrib if col_acc is None else col_acc + contrib
        conv = conv + jnp.where(col_masks[v], col_acc, 0.0)

    # Cast the (small) mask once; keep the big multiply in x's native dtype.
    attn = jax.nn.sigmoid(conv).astype(o_ref.dtype)           # (Nb, 1, HW_lane)
    # Hoist the sublane broadcast out of the apply loop (JAX does not CSE it).
    attn_b = jnp.broadcast_to(attn, (Nb, c_chunk, HW_lane))

    # ---- Phase 4: second (final) pass over C: out = x * attn ---------------
    if n_full > 8:
        def p4_body(i, _):
            c0 = pl.multiple_of(i * c_chunk, c_chunk)
            o_ref[:, pl.ds(c0, c_chunk), :] = (
                x_ref[:, pl.ds(c0, c_chunk), :] * attn_b).astype(o_ref.dtype)
            return 0
        lax.fori_loop(0, n_full, p4_body, 0, unroll=2)
        if rem:
            o_ref[:, C - rem:C, :] = (
                x_ref[:, C - rem:C, :] * attn_b[:, :rem, :]).astype(o_ref.dtype)
    else:
        for c0 in range(0, C, c_chunk):
            cb = min(C, c0 + c_chunk) - c0
            o_ref[:, c0:c0 + cb, :] = (
                x_ref[:, c0:c0 + cb, :] * attn_b[:, :cb, :]).astype(o_ref.dtype)


def spatial_attention(x, weight, bias, kernel_size):
    """x: (N, C, H, W); weight: (1, 2, k, k); bias: (1,)."""
    N, C, H, W = x.shape
    k = int(kernel_size)
    assert k % 2 == 1, f"kernel_size = {k}"
    assert weight.shape == (1, 2, k, k)

    p = (k - 1) // 2
    HW = H * W
    HW_lane = _round_up(HW, 128)        # lane-dense stores (full-lane vst)
    base = p * (W + 1)                  # unaligned flat offset of map(0, 0)
    istart = _round_up(base, 128)       # lane-aligned interior start
    delta = istart - base
    pad_len = _round_up(delta + 2 * base + HW_lane, 128)

    # Flatten conv params into one small SMEM-resident vector: [w..., bias].
    params = jnp.concatenate(
        [weight.reshape(-1).astype(jnp.float32),
         bias.reshape(-1).astype(jnp.float32)])

    # Lane-dense view of x (free reshape); pad spatial dim to a 128 multiple.
    x_flat = x.reshape(N, C, HW)
    if HW_lane != HW:
        x_flat = jnp.pad(x_flat, ((0, 0), (0, 0), (0, HW_lane - HW)))

    # Dtype-aware channel chunk: full (8*packing, 128) vregs per reduce step.
    sub = max(1, 4 // x.dtype.itemsize)
    c_chunk = min(C, 8 * sub)

    # ---- Per-generation VMEM budget (derived from hardware, not hardcoded) --
    try:
        vmem_cap = int(pltpu.get_tpu_info().vmem_capacity_bytes)
        if vmem_cap < (32 << 20):
            vmem_cap = 64 << 20
    except Exception:
        vmem_cap = 64 << 20             # conservative: v7x per-core VMEM
    # v7x (64 MiB) -> 48 MiB limit; v5e/v6e (128 MiB) -> 96 MiB limit.
    vmem_limit = min((vmem_cap * 3) // 4, 96 << 20)

    bytes_per_batch = C * HW_lane * x.dtype.itemsize
    # 2x double-buffered input blocks + 2x output blocks + padded-map scratch.
    foot_per_batch = 4 * bytes_per_batch + 2 * pad_len * 4
    margin = 2 << 20

    # Keep >= 2 grid steps when N >= 2 so v7x can shard the "parallel" batch
    # axis across its two TensorCores (no-op cost on single-TC v5e/v6e).
    max_nb = max(1, N // 2) if N >= 2 else 1
    Nb = 1
    for d in range(1, N + 1):
        if N % d == 0 and d <= max_nb and d * foot_per_batch + margin <= vmem_limit:
            Nb = d

    # If even a single batch element overflows the budget, raise the limit
    # toward physical VMEM so the kernel still compiles.
    # TODO(synk): H-row tiling with a +/-p halo per tile for single batch
    # elements larger than VMEM (keeps x single-sweep instead of C two-sweep).
    needed = Nb * foot_per_batch + margin
    if needed > vmem_limit:
        vmem_limit = min(needed, vmem_cap)

    kernel = functools.partial(
        _spatial_attention_kernel, k=k, C=C, W=W, HW=HW, HW_lane=HW_lane,
        Nb=Nb, c_chunk=c_chunk, delta=delta, istart=istart, pad_len=pad_len)

    out_flat = pl.pallas_call(
        kernel,
        out_shape=jax.ShapeDtypeStruct((N, C, HW_lane), x.dtype),
        grid=(N // Nb,),
        in_specs=[
            pl.BlockSpec(memory_space=pltpu.MemorySpace.SMEM),       # conv params
            pl.BlockSpec((Nb, C, HW_lane), lambda n: (n, 0, 0)),     # x block
        ],
        out_specs=pl.BlockSpec((Nb, C, HW_lane), lambda n: (n, 0, 0)),
        scratch_shapes=[pltpu.VMEM((Nb, 2, pad_len), jnp.float32)],  # padded maps
        compiler_params=pltpu.CompilerParams(
            dimension_semantics=("parallel",),
            vmem_limit_bytes=int(vmem_limit)),
    )(params, x_flat)

    out = out_flat[:, :, :HW] if HW_lane != HW else out_flat
    return out.reshape(N, C, H, W)


def _reference(x, weight, bias):
    """Pure-JAX reference matching the PyTorch module semantics."""
    avg = jnp.mean(x, axis=1, keepdims=True)
    mx = jnp.max(x, axis=1, keepdims=True)
    mask = jnp.concatenate([avg, mx], axis=1)
    conv = lax.conv_general_dilated(
        mask, weight, window_strides=(1, 1), padding="SAME",
        dimension_numbers=("NCHW", "OIHW", "NCHW"))
    conv = conv + bias.reshape(1, -1, 1, 1)
    return x * jax.nn.sigmoid(conv)


if __name__ == "__main__":
    kernel_size = 7
    N, C, H, W = 2, 4, 16, 16

    key = jax.random.PRNGKey(0)
    kx, kw, kb = jax.random.split(key, 3)
    x = jax.random.normal(kx, (N, C, H, W), dtype=jnp.float32)
    # Deterministic synthetic conv parameters (Conv2d(2, 1, k, padding=(k-1)//2)).
    weight = jax.random.normal(kw, (1, 2, kernel_size, kernel_size), dtype=jnp.float32) * 0.1
    bias = jax.random.normal(kb, (1,), dtype=jnp.float32) * 0.1

    out = spatial_attention(x, weight, bias, kernel_size)
    out = jax.block_until_ready(out)

    ref = _reference(x, weight, bias)
    assert out.shape == ref.shape and out.dtype == ref.dtype
    assert jnp.allclose(out, ref, atol=1e-5, rtol=1e-5), \
        f"max abs err = {jnp.max(jnp.abs(out - ref))}"

    print("KERNEL_OK")
</pallas_src>

<mosaic_0001>
module attributes {stable_mosaic.version = 11 : i64} {
  func.func @_spatial_attention_kernel(%arg0: i32, %arg1: memref<99xf32, #tpu.memory_space<smem>>, %arg2: memref<1x4x256xf32, #tpu.memory_space<vmem>>, %arg3: memref<1x4x256xf32, #tpu.memory_space<vmem>>, %arg4: memref<1x2x512xf32, #tpu.memory_space<vmem>>) attributes {dimension_semantics = [#tpu.dimension_semantics<parallel>], iteration_bounds = array<i64: 2>, scalar_prefetch = 0 : i64, scratch_operands = 1 : i64, tpu.core_type = #tpu.core_type<tc>, window_params = [{transform_indices = @transform_0, window_bounds = array<i64: 99>}, {transform_indices = @transform_1, window_bounds = array<i64: 1, 4, 256>}, {transform_indices = @transform_2, window_bounds = array<i64: 1, 4, 256>}]} {
    %cst = arith.constant 0.000000e+00 : f32
    %0 = vector.broadcast %cst : f32 to vector<1x1x256xf32>
    %cst_0 = arith.constant 0xFF800000 : f32
    %1 = vector.broadcast %cst_0 : f32 to vector<1x1x256xf32>
    %c0 = arith.constant 0 : index
    %c0_1 = arith.constant 0 : index
    %c0_2 = arith.constant 0 : index
    %2 = vector.load %arg2[%c0, %c0_1, %c0_2] : memref<1x4x256xf32, #tpu.memory_space<vmem>>, vector<1x4x256xf32>
    %cst_3 = arith.constant dense<0.000000e+00> : vector<1x256xf32>
    %3 = vector.multi_reduction <add>, %2, %cst_3 [1] : vector<1x4x256xf32> to vector<1x256xf32>
    %4 = vector.shape_cast %3 : vector<1x256xf32> to vector<1x1x256xf32>
    %5 = arith.addf %0, %4 : vector<1x1x256xf32>
    %cst_4 = arith.constant dense<0xFF800000> : vector<1x256xf32>
    %6 = vector.multi_reduction <maximumf>, %2, %cst_4 [1] : vector<1x4x256xf32> to vector<1x256xf32>
    %7 = vector.shape_cast %6 : vector<1x256xf32> to vector<1x1x256xf32>
    %8 = arith.maximumf %1, %7 : vector<1x1x256xf32>
    %cst_5 = arith.constant 2.500000e-01 : f32
    %9 = vector.broadcast %cst_5 : f32 to vector<1x1x256xf32>
    %10 = arith.mulf %5, %9 : vector<1x1x256xf32>
    %cst_6 = arith.constant 0.000000e+00 : f32
    %11 = vector.broadcast %cst_6 : f32 to vector<1x2x128xf32>
    %c0_7 = arith.constant 0 : index
    %c0_8 = arith.constant 0 : index
    %c0_9 = arith.constant 0 : index
    %12 = vector.load %arg4[%c0_7, %c0_8, %c0_9] : memref<1x2x512xf32, #tpu.memory_space<vmem>>, vector<1x2x128xf32>
    tpu.vector_store %arg4[%c0_7, %c0_8, %c0_9], %11 {strides = array<i32>} : memref<1x2x512xf32, #tpu.memory_space<vmem>>, vector<1x2x128xf32>,
    %cst_10 = arith.constant 0.000000e+00 : f32
    %13 = vector.broadcast %cst_10 : f32 to vector<1x2x128xf32>
    %c0_11 = arith.constant 0 : index
    %c0_12 = arith.constant 0 : index
    %c384 = arith.constant 384 : index
    %14 = vector.load %arg4[%c0_11, %c0_12, %c384] : memref<1x2x512xf32, #tpu.memory_space<vmem>>, vector<1x2x128xf32>
    tpu.vector_store %arg4[%c0_11, %c0_12, %c384], %13 {strides = array<i32>} : memref<1x2x512xf32, #tpu.memory_space<vmem>>, vector<1x2x128xf32>,
    %c0_13 = arith.constant 0 : index
    %c0_14 = arith.constant 0 : index
    %c128 = arith.constant 128 : index
    %15 = vector.load %arg4[%c0_13, %c0_14, %c128] : memref<1x2x512xf32, #tpu.memory_space<vmem>>, vector<1x1x256xf32>
    tpu.vector_store %arg4[%c0_13, %c0_14, %c128], %10 {strides = array<i32>} : memref<1x2x512xf32, #tpu.memory_space<vmem>>, vector<1x1x256xf32>,
    %c0_15 = arith.constant 0 : index
    %c1 = arith.constant 1 : index
    %c128_16 = arith.constant 128 : index
    %16 = vector.load %arg4[%c0_15, %c1, %c128_16] : memref<1x2x512xf32, #tpu.memory_space<vmem>>, vector<1x1x256xf32>
    tpu.vector_store %arg4[%c0_15, %c1, %c128_16], %8 {strides = array<i32>} : memref<1x2x512xf32, #tpu.memory_space<vmem>>, vector<1x1x256xf32>,
    %17 = tpu.iota {dimensions = array<i32: 2>} : vector<1x1x256xi32>
    %c16_i32 = arith.constant 16 : i32
    %c0_i32 = arith.constant 0 : i32
    %18 = arith.cmpi eq, %c16_i32, %c0_i32 : i32
    %c1_i32 = arith.constant 1 : i32
    %19 = arith.select %18, %c1_i32, %c16_i32 : i32
    %20 = vector.broadcast %19 : i32 to vector<1x1x256xi32>
    %21 = arith.remsi %17, %20 : vector<1x1x256xi32>
    %c0_i32_17 = arith.constant 0 : i32
    %22 = vector.broadcast %c0_i32_17 : i32 to vector<1x1x256xi32>
    %23 = arith.cmpi ne, %21, %22 : vector<1x1x256xi32>
    %c0_i32_18 = arith.constant 0 : i32
    %24 = vector.broadcast %c0_i32_18 : i32 to vector<1x1x256xi32>
    %25 = arith.cmpi slt, %21, %24 : vector<1x1x256xi32>
    %c0_i32_19 = arith.constant 0 : i32
    %26 = arith.cmpi slt, %19, %c0_i32_19 : i32
    %27 = vector.broadcast %26 : i1 to vector<1x1x256xi1>
    %28 = vector.broadcast %27 : vector<1x1x256xi1> to vector<1x1x256xi1>
    %29 = arith.xori %25, %28 : vector<1x1x256xi1>
    %30 = arith.andi %29, %23 : vector<1x1x256xi1>
    %31 = vector.broadcast %19 : i32 to vector<1x1x256xi32>
    %32 = arith.addi %21, %31 : vector<1x1x256xi32>
    %33 = arith.select %30, %32, %21 : vector<1x1x256xi1>, vector<1x1x256xi32>
    %c3_i32 = arith.constant 3 : i32
    %34 = vector.broadcast %c3_i32 : i32 to vector<1x1x256xi32>
    %35 = arith.cmpi sge, %33, %34 : vector<1x1x256xi32>
    %c19_i32 = arith.constant 19 : i32
    %36 = vector.broadcast %c19_i32 : i32 to vector<1x1x256xi32>
    %37 = arith.cmpi slt, %33, %36 : vector<1x1x256xi32>
    %38 = arith.andi %35, %37 : vector<1x1x256xi1>
    %c2_i32 = arith.constant 2 : i32
    %39 = vector.broadcast %c2_i32 : i32 to vector<1x1x256xi32>
    %40 = arith.cmpi sge, %33, %39 : vector<1x1x256xi32>
    %c18_i32 = arith.constant 18 : i32
    %41 = vector.broadcast %c18_i32 : i32 to vector<1x1x256xi32>
    %42 = arith.cmpi slt, %33, %41 : vector<1x1x256xi32>
    %43 = arith.andi %40, %42 : vector<1x1x256xi1>
    %c1_i32_20 = arith.constant 1 : i32
    %44 = vector.broadcast %c1_i32_20 : i32 to vector<1x1x256xi32>
    %45 = arith.cmpi sge, %33, %44 : vector<1x1x256xi32>
    %c17_i32 = arith.constant 17 : i32
    %46 = vector.broadcast %c17_i32 : i32 to vector<1x1x256xi32>
    %47 = arith.cmpi slt, %33, %46 : vector<1x1x256xi32>
    %48 = arith.andi %45, %47 : vector<1x1x256xi1>
    %c0_i32_21 = arith.constant 0 : i32
    %49 = vector.broadcast %c0_i32_21 : i32 to vector<1x1x256xi32>
    %50 = arith.cmpi sge, %33, %49 : vector<1x1x256xi32>
    %c16_i32_22 = arith.constant 16 : i32
    %51 = vector.broadcast %c16_i32_22 : i32 to vector<1x1x256xi32>
    %52 = arith.cmpi slt, %33, %51 : vector<1x1x256xi32>
    %53 = arith.andi %50, %52 : vector<1x1x256xi1>
    %c-1_i32 = arith.constant -1 : i32
    %54 = vector.broadcast %c-1_i32 : i32 to vector<1x1x256xi32>
    %55 = arith.cmpi sge, %33, %54 : vector<1x1x256xi32>
    %c15_i32 = arith.constant 15 : i32
    %56 = vector.broadcast %c15_i32 : i32 to vector<1x1x256xi32>
    %57 = arith.cmpi slt, %33, %56 : vector<1x1x256xi32>
    %58 = arith.andi %55, %57 : vector<1x1x256xi1>
    %c-2_i32 = arith.constant -2 : i32
    %59 = vector.broadcast %c-2_i32 : i32 to vector<1x1x256xi32>
    %60 = arith.cmpi sge, %33, %59 : vector<1x1x256xi32>
    %c14_i32 = arith.constant 14 : i32
    %61 = vector.broadcast %c14_i32 : i32 to vector<1x1x256xi32>
    %62 = arith.cmpi slt, %33, %61 : vector<1x1x256xi32>
    %63 = arith.andi %60, %62 : vector<1x1x256xi1>
    %c-3_i32 = arith.constant -3 : i32
    %64 = vector.broadcast %c-3_i32 : i32 to vector<1x1x256xi32>
    %65 = arith.cmpi sge, %33, %64 : vector<1x1x256xi32>
    %c13_i32 = arith.constant 13 : i32
    %66 = vector.broadcast %c13_i32 : i32 to vector<1x1x256xi32>
    %67 = arith.cmpi slt, %33, %66 : vector<1x1x256xi32>
    %68 = arith.andi %65, %67 : vector<1x1x256xi1>
    %c98 = arith.constant 98 : index
    %69 = memref.load %arg1[%c98] : memref<99xf32, #tpu.memory_space<smem>>
    %70 = vector.broadcast %69 : f32 to vector<1x1x256xf32>
    %c0_23 = arith.constant 0 : index
    %c0_24 = arith.constant 0 : index
    %c77 = arith.constant 77 : index
    %71 = vector.load %arg4[%c0_23, %c0_24, %c77] : memref<1x2x512xf32, #tpu.memory_space<vmem>>, vector<1x2x256xf32>
    %c0_25 = arith.constant 0 : index
    %72 = memref.load %arg1[%c0_25] : memref<99xf32, #tpu.memory_space<smem>>
    %c49 = arith.constant 49 : index
    %73 = memref.load %arg1[%c49] : memref<99xf32, #tpu.memory_space<smem>>
    %74 = vector.extract_strided_slice %71 {offsets = [0, 0, 0], sizes = [1, 1, 256], strides = [1, 1, 1]} : vector<1x2x256xf32> to vector<1x1x256xf32>
    %75 = vector.broadcast %72 : f32 to vector<1x1x256xf32>
    %76 = arith.mulf %75, %74 : vector<1x1x256xf32>
    %77 = vector.extract_strided_slice %71 {offsets = [0, 1, 0], sizes = [1, 1, 256], strides = [1, 1, 1]} : vector<1x2x256xf32> to vector<1x1x256xf32>
    %78 = vector.broadcast %73 : f32 to vector<1x1x256xf32>
    %79 = arith.mulf %78, %77 : vector<1x1x256xf32>
    %80 = arith.addf %76, %79 : vector<1x1x256xf32>
    %c0_26 = arith.constant 0 : index
    %c0_27 = arith.constant 0 : index
    %c93 = arith.constant 93 : index
    %81 = vector.load %arg4[%c0_26, %c0_27, %c93] : memref<1x2x512xf32, #tpu.memory_space<vmem>>, vector<1x2x256xf32>
    %c7 = arith.constant 7 : index
    %82 = memref.load %arg1[%c7] : memref<99xf32, #tpu.memory_space<smem>>
    %c56 = arith.constant 56 : index
    %83 = memref.load %arg1[%c56] : memref<99xf32, #tpu.memory_space<smem>>
    %84 = vector.extract_strided_slice %81 {offsets = [0, 0, 0], sizes = [1, 1, 256], strides = [1, 1, 1]} : vector<1x2x256xf32> to vector<1x1x256xf32>
    %85 = vector.broadcast %82 : f32 to vector<1x1x256xf32>
    %86 = arith.mulf %85, %84 : vector<1x1x256xf32>
    %87 = vector.extract_strided_slice %81 {offsets = [0, 1, 0], sizes = [1, 1, 256], strides = [1, 1, 1]} : vector<1x2x256xf32> to vector<1x1x256xf32>
    %88 = vector.broadcast %83 : f32 to vector<1x1x256xf32>
    %89 = arith.mulf %88, %87 : vector<1x1x256xf32>
    %90 = arith.addf %86, %89 : vector<1x1x256xf32>
    %91 = arith.addf %80, %90 : vector<1x1x256xf32>
    %c0_28 = arith.constant 0 : index
    %c0_29 = arith.constant 0 : index
    %c109 = arith.constant 109 : index
    %92 = vector.load %arg4[%c0_28, %c0_29, %c109] : memref<1x2x512xf32, #tpu.memory_space<vmem>>, vector<1x2x256xf32>
    %c14 = arith.constant 14 : index
    %93 = memref.load %arg1[%c14] : memref<99xf32, #tpu.memory_space<smem>>
    %c63 = arith.constant 63 : index
    %94 = memref.load %arg1[%c63] : memref<99xf32, #tpu.memory_space<smem>>
    %95 = vector.extract_strided_slice %92 {offsets = [0, 0, 0], sizes = [1, 1, 256], strides = [1, 1, 1]} : vector<1x2x256xf32> to vector<1x1x256xf32>
    %96 = vector.broadcast %93 : f32 to vector<1x1x256xf32>
    %97 = arith.mulf %96, %95 : vector<1x1x256xf32>
    %98 = vector.extract_strided_slice %92 {offsets = [0, 1, 0], sizes = [1, 1, 256], strides = [1, 1, 1]} : vector<1x2x256xf32> to vector<1x1x256xf32>
    %99 = vector.broadcast %94 : f32 to vector<1x1x256xf32>
    %100 = arith.mulf %99, %98 : vector<1x1x256xf32>
    %101 = arith.addf %97, %100 : vector<1x1x256xf32>
    %102 = arith.addf %91, %101 : vector<1x1x256xf32>
    %c0_30 = arith.constant 0 : index
    %c0_31 = arith.constant 0 : index
    %c125 = arith.constant 125 : index
    %103 = vector.load %arg4[%c0_30, %c0_31, %c125] : memref<1x2x512xf32, #tpu.memory_space<vmem>>, vector<1x2x256xf32>
    %c21 = arith.constant 21 : index
    %104 = memref.load %arg1[%c21] : memref<99xf32, #tpu.memory_space<smem>>
    %c70 = arith.constant 70 : index
    %105 = memref.load %arg1[%c70] : memref<99xf32, #tpu.memory_space<smem>>
    %106 = vector.extract_strided_slice %103 {offsets = [0, 0, 0], sizes = [1, 1, 256], strides = [1, 1, 1]} : vector<1x2x256xf32> to vector<1x1x256xf32>
    %107 = vector.broadcast %104 : f32 to vector<1x1x256xf32>
    %108 = arith.mulf %107, %106 : vector<1x1x256xf32>
    %109 = vector.extract_strided_slice %103 {offsets = [0, 1, 0], sizes = [1, 1, 256], strides = [1, 1, 1]} : vector<1x2x256xf32> to vector<1x1x256xf32>
    %110 = vector.broadcast %105 : f32 to vector<1x1x256xf32>
    %111 = arith.mulf %110, %109 : vector<1x1x256xf32>
    %112 = arith.addf %108, %111 : vector<1x1x256xf32>
    %113 = arith.addf %102, %112 : vector<1x1x256xf32>
    %c0_32 = arith.constant 0 : index
    %c0_33 = arith.constant 0 : index
    %c141 = arith.constant 141 : index
    %114 = vector.load %arg4[%c0_32, %c0_33, %c141] : memref<1x2x512xf32, #tpu.memory_space<vmem>>, vector<1x2x256xf32>
    %c28 = arith.constant 28 : index
    %115 = memref.load %arg1[%c28] : memref<99xf32, #tpu.memory_space<smem>>
    %c77_34 = arith.constant 77 : index
    %116 = memref.load %arg1[%c77_34] : memref<99xf32, #tpu.memory_space<smem>>
    %117 = vector.extract_strided_slice %114 {offsets = [0, 0, 0], sizes = [1, 1, 256], strides = [1, 1, 1]} : vector<1x2x256xf32> to vector<1x1x256xf32>
    %118 = vector.broadcast %115 : f32 to vector<1x1x256xf32>
    %119 = arith.mulf %118, %117 : vector<1x1x256xf32>
    %120 = vector.extract_strided_slice %114 {offsets = [0, 1, 0], sizes = [1, 1, 256], strides = [1, 1, 1]} : vector<1x2x256xf32> to vector<1x1x256xf32>
    %121 = vector.broadcast %116 : f32 to vector<1x1x256xf32>
    %122 = arith.mulf %121, %120 : vector<1x1x256xf32>
    %123 = arith.addf %119, %122 : vector<1x1x256xf32>
    %124 = arith.addf %113, %123 : vector<1x1x256xf32>
    %c0_35 = arith.constant 0 : index
    %c0_36 = arith.constant 0 : index
    %c157 = arith.constant 157 : index
    %125 = vector.load %arg4[%c0_35, %c0_36, %c157] : memref<1x2x512xf32, #tpu.memory_space<vmem>>, vector<1x2x256xf32>
    %c35 = arith.constant 35 : index
    %126 = memref.load %arg1[%c35] : memref<99xf32, #tpu.memory_space<smem>>
    %c84 = arith.constant 84 : index
    %127 = memref.load %arg1[%c84] : memref<99xf32, #tpu.memory_space<smem>>
    %128 = vector.extract_strided_slice %125 {offsets = [0, 0, 0], sizes = [1, 1, 256], strides = [1, 1, 1]} : vector<1x2x256xf32> to vector<1x1x256xf32>
    %129 = vector.broadcast %126 : f32 to vector<1x1x256xf32>
    %130 = arith.mulf %129, %128 : vector<1x1x256xf32>
    %131 = vector.extract_strided_slice %125 {offsets = [0, 1, 0], sizes = [1, 1, 256], strides = [1, 1, 1]} : vector<1x2x256xf32> to vector<1x1x256xf32>
    %132 = vector.broadcast %127 : f32 to vector<1x1x256xf32>
    %133 = arith.mulf %132, %131 : vector<1x1x256xf32>
    %134 = arith.addf %130, %133 : vector<1x1x256xf32>
    %135 = arith.addf %124, %134 : vector<1x1x256xf32>
    %c0_37 = arith.constant 0 : index
    %c0_38 = arith.constant 0 : index
    %c173 = arith.constant 173 : index
    %136 = vector.load %arg4[%c0_37, %c0_38, %c173] : memref<1x2x512xf32, #tpu.memory_space<vmem>>, vector<1x2x256xf32>
    %c42 = arith.constant 42 : index
    %137 = memref.load %arg1[%c42] : memref<99xf32, #tpu.memory_space<smem>>
    %c91 = arith.constant 91 : index
    %138 = memref.load %arg1[%c91] : memref<99xf32, #tpu.memory_space<smem>>
    %139 = vector.extract_strided_slice %136 {offsets = [0, 0, 0], sizes = [1, 1, 256], strides = [1, 1, 1]} : vector<1x2x256xf32> to vector<1x1x256xf32>
    %140 = vector.broadcast %137 : f32 to vector<1x1x256xf32>
    %141 = arith.mulf %140, %139 : vector<1x1x256xf32>
    %142 = vector.extract_strided_slice %136 {offsets = [0, 1, 0], sizes = [1, 1, 256], strides = [1, 1, 1]} : vector<1x2x256xf32> to vector<1x1x256xf32>
    %143 = vector.broadcast %138 : f32 to vector<1x1x256xf32>
    %144 = arith.mulf %143, %142 : vector<1x1x256xf32>
    %145 = arith.addf %141, %144 : vector<1x1x256xf32>
    %146 = arith.addf %135, %145 : vector<1x1x256xf32>
    %cst_39 = arith.constant 0.000000e+00 : f32
    %147 = vector.broadcast %cst_39 : f32 to vector<1x1x256xf32>
    %148 = arith.select %38, %146, %147 : vector<1x1x256xi1>, vector<1x1x256xf32>
    %149 = arith.addf %70, %148 : vector<1x1x256xf32>
    %c0_40 = arith.constant 0 : index
    %c0_41 = arith.constant 0 : index
    %c78 = arith.constant 78 : index
    %150 = vector.load %arg4[%c0_40, %c0_41, %c78] : memref<1x2x512xf32, #tpu.memory_space<vmem>>, vector<1x2x256xf32>
    %c1_42 = arith.constant 1 : index
    %151 = memref.load %arg1[%c1_42] : memref<99xf32, #tpu.memory_space<smem>>
    %c50 = arith.constant 50 : index
    %152 = memref.load %arg1[%c50] : memref<99xf32, #tpu.memory_space<smem>>
    %153 = vector.extract_strided_slice %150 {offsets = [0, 0, 0], sizes = [1, 1, 256], strides = [1, 1, 1]} : vector<1x2x256xf32> to vector<1x1x256xf32>
    %154 = vector.broadcast %151 : f32 to vector<1x1x256xf32>
    %155 = arith.mulf %154, %153 : vector<1x1x256xf32>
    %156 = vector.extract_strided_slice %150 {offsets = [0, 1, 0], sizes = [1, 1, 256], strides = [1, 1, 1]} : vector<1x2x256xf32> to vector<1x1x256xf32>
    %157 = vector.broadcast %152 : f32 to vector<1x1x256xf32>
    %158 = arith.mulf %157, %156 : vector<1x1x256xf32>
    %159 = arith.addf %155, %158 : vector<1x1x256xf32>
    %c0_43 = arith.constant 0 : index
    %c0_44 = arith.constant 0 : index
    %c94 = arith.constant 94 : index
    %160 = vector.load %arg4[%c0_43, %c0_44, %c94] : memref<1x2x512xf32, #tpu.memory_space<vmem>>, vector<1x2x256xf32>
    %c8 = arith.constant 8 : index
    %161 = memref.load %arg1[%c8] : memref<99xf32, #tpu.memory_space<smem>>
    %c57 = arith.constant 57 : index
    %162 = memref.load %arg1[%c57] : memref<99xf32, #tpu.memory_space<smem>>
    %163 = vector.extract_strided_slice %160 {offsets = [0, 0, 0], sizes = [1, 1, 256], strides = [1, 1, 1]} : vector<1x2x256xf32> to vector<1x1x256xf32>
    %164 = vector.broadcast %161 : f32 to vector<1x1x256xf32>
    %165 = arith.mulf %164, %163 : vector<1x1x256xf32>
    %166 = vector.extract_strided_slice %160 {offsets = [0, 1, 0], sizes = [1, 1, 256], strides = [1, 1, 1]} : vector<1x2x256xf32> to vector<1x1x256xf32>
    %167 = vector.broadcast %162 : f32 to vector<1x1x256xf32>
    %168 = arith.mulf %167, %166 : vector<1x1x256xf32>
    %169 = arith.addf %165, %168 : vector<1x1x256xf32>
    %170 = arith.addf %159, %169 : vector<1x1x256xf32>
    %c0_45 = arith.constant 0 : index
    %c0_46 = arith.constant 0 : index
    %c110 = arith.constant 110 : index
    %171 = vector.load %arg4[%c0_45, %c0_46, %c110] : memref<1x2x512xf32, #tpu.memory_space<vmem>>, vector<1x2x256xf32>
    %c15 = arith.constant 15 : index
    %172 = memref.load %arg1[%c15] : memref<99xf32, #tpu.memory_space<smem>>
    %c64 = arith.constant 64 : index
    %173 = memref.load %arg1[%c64] : memref<99xf32, #tpu.memory_space<smem>>
    %174 = vector.extract_strided_slice %171 {offsets = [0, 0, 0], sizes = [1, 1, 256], strides = [1, 1, 1]} : vector<1x2x256xf32> to vector<1x1x256xf32>
    %175 = vector.broadcast %172 : f32 to vector<1x1x256xf32>
    %176 = arith.mulf %175, %174 : vector<1x1x256xf32>
    %177 = vector.extract_strided_slice %171 {offsets = [0, 1, 0], sizes = [1, 1, 256], strides = [1, 1, 1]} : vector<1x2x256xf32> to vector<1x1x256xf32>
    %178 = vector.broadcast %173 : f32 to vector<1x1x256xf32>
    %179 = arith.mulf %178, %177 : vector<1x1x256xf32>
    %180 = arith.addf %176, %179 : vector<1x1x256xf32>
    %181 = arith.addf %170, %180 : vector<1x1x256xf32>
    %c0_47 = arith.constant 0 : index
    %c0_48 = arith.constant 0 : index
    %c126 = arith.constant 126 : index
    %182 = vector.load %arg4[%c0_47, %c0_48, %c126] : memref<1x2x512xf32, #tpu.memory_space<vmem>>, vector<1x2x256xf32>
    %c22 = arith.constant 22 : index
    %183 = memref.load %arg1[%c22] : memref<99xf32, #tpu.memory_space<smem>>
    %c71 = arith.constant 71 : index
    %184 = memref.load %arg1[%c71] : memref<99xf32, #tpu.memory_space<smem>>
    %185 = vector.extract_strided_slice %182 {offsets = [0, 0, 0], sizes = [1, 1, 256], strides = [1, 1, 1]} : vector<1x2x256xf32> to vector<1x1x256xf32>
    %186 = vector.broadcast %183 : f32 to vector<1x1x256xf32>
    %187 = arith.mulf %186, %185 : vector<1x1x256xf32>
    %188 = vector.extract_strided_slice %182 {offsets = [0, 1, 0], sizes = [1, 1, 256], strides = [1, 1, 1]} : vector<1x2x256xf32> to vector<1x1x256xf32>
    %189 = vector.broadcast %184 : f32 to vector<1x1x256xf32>
    %190 = arith.mulf %189, %188 : vector<1x1x256xf32>
    %191 = arith.addf %187, %190 : vector<1x1x256xf32>
    %192 = arith.addf %181, %191 : vector<1x1x256xf32>
    %c0_49 = arith.constant 0 : index
    %c0_50 = arith.constant 0 : index
    %c142 = arith.constant 142 : index
    %193 = vector.load %arg4[%c0_49, %c0_50, %c142] : memref<1x2x512xf32, #tpu.memory_space<vmem>>, vector<1x2x256xf32>
    %c29 = arith.constant 29 : index
    %194 = memref.load %arg1[%c29] : memref<99xf32, #tpu.memory_space<smem>>
    %c78_51 = arith.constant 78 : index
    %195 = memref.load %arg1[%c78_51] : memref<99xf32, #tpu.memory_space<smem>>
    %196 = vector.extract_strided_slice %193 {offsets = [0, 0, 0], sizes = [1, 1, 256], strides = [1, 1, 1]} : vector<1x2x256xf32> to vector<1x1x256xf32>
    %197 = vector.broadcast %194 : f32 to vector<1x1x256xf32>
    %198 = arith.mulf %197, %196 : vector<1x1x256xf32>
    %199 = vector.extract_strided_slice %193 {offsets = [0, 1, 0], sizes = [1, 1, 256], strides = [1, 1, 1]} : vector<1x2x256xf32> to vector<1x1x256xf32>
    %200 = vector.broadcast %195 : f32 to vector<1x1x256xf32>
    %201 = arith.mulf %200, %199 : vector<1x1x256xf32>
    %202 = arith.addf %198, %201 : vector<1x1x256xf32>
    %203 = arith.addf %192, %202 : vector<1x1x256xf32>
    %c0_52 = arith.constant 0 : index
    %c0_53 = arith.constant 0 : index
    %c158 = arith.constant 158 : index
    %204 = vector.load %arg4[%c0_52, %c0_53, %c158] : memref<1x2x512xf32, #tpu.memory_space<vmem>>, vector<1x2x256xf32>
    %c36 = arith.constant 36 : index
    %205 = memref.load %arg1[%c36] : memref<99xf32, #tpu.memory_space<smem>>
    %c85 = arith.constant 85 : index
    %206 = memref.load %arg1[%c85] : memref<99xf32, #tpu.memory_space<smem>>
    %207 = vector.extract_strided_slice %204 {offsets = [0, 0, 0], sizes = [1, 1, 256], strides = [1, 1, 1]} : vector<1x2x256xf32> to vector<1x1x256xf32>
    %208 = vector.broadcast %205 : f32 to vector<1x1x256xf32>
    %209 = arith.mulf %208, %207 : vector<1x1x256xf32>
    %210 = vector.extract_strided_slice %204 {offsets = [0, 1, 0], sizes = [1, 1, 256], strides = [1, 1, 1]} : vector<1x2x256xf32> to vector<1x1x256xf32>
    %211 = vector.broadcast %206 : f32 to vector<1x1x256xf32>
    %212 = arith.mulf %211, %210 : vector<1x1x256xf32>
    %213 = arith.addf %209, %212 : vector<1x1x256xf32>
    %214 = arith.addf %203, %213 : vector<1x1x256xf32>
    %c0_54 = arith.constant 0 : index
    %c0_55 = arith.constant 0 : index
    %c174 = arith.constant 174 : index
    %215 = vector.load %arg4[%c0_54, %c0_55, %c174] : memref<1x2x512xf32, #tpu.memory_space<vmem>>, vector<1x2x256xf32>
    %c43 = arith.constant 43 : index
    %216 = memref.load %arg1[%c43] : memref<99xf32, #tpu.memory_space<smem>>
    %c92 = arith.constant 92 : index
    %217 = memref.load %arg1[%c92] : memref<99xf32, #tpu.memory_space<smem>>
    %218 = vector.extract_strided_slice %215 {offsets = [0, 0, 0], sizes = [1, 1, 256], strides = [1, 1, 1]} : vector<1x2x256xf32> to vector<1x1x256xf32>
    %219 = vector.broadcast %216 : f32 to vector<1x1x256xf32>
    %220 = arith.mulf %219, %218 : vector<1x1x256xf32>
    %221 = vector.extract_strided_slice %215 {offsets = [0, 1, 0], sizes = [1, 1, 256], strides = [1, 1, 1]} : vector<1x2x256xf32> to vector<1x1x256xf32>
    %222 = vector.broadcast %217 : f32 to vector<1x1x256xf32>
    %223 = arith.mulf %222, %221 : vector<1x1x256xf32>
    %224 = arith.addf %220, %223 : vector<1x1x256xf32>
    %225 = arith.addf %214, %224 : vector<1x1x256xf32>
    %cst_56 = arith.constant 0.000000e+00 : f32
    %226 = vector.broadcast %cst_56 : f32 to vector<1x1x256xf32>
    %227 = arith.select %43, %225, %226 : vector<1x1x256xi1>, vector<1x1x256xf32>
    %228 = arith.addf %149, %227 : vector<1x1x256xf32>
    %c0_57 = arith.constant 0 : index
    %c0_58 = arith.constant 0 : index
    %c79 = arith.constant 79 : index
    %229 = vector.load %arg4[%c0_57, %c0_58, %c79] : memref<1x2x512xf32, #tpu.memory_space<vmem>>, vector<1x2x256xf32>
    %c2 = arith.constant 2 : index
    %230 = memref.load %arg1[%c2] : memref<99xf32, #tpu.memory_space<smem>>
    %c51 = arith.constant 51 : index
    %231 = memref.load %arg1[%c51] : memref<99xf32, #tpu.memory_space<smem>>
    %232 = vector.extract_strided_slice %229 {offsets = [0, 0, 0], sizes = [1, 1, 256], strides = [1, 1, 1]} : vector<1x2x256xf32> to vector<1x1x256xf32>
    %233 = vector.broadcast %230 : f32 to vector<1x1x256xf32>
    %234 = arith.mulf %233, %232 : vector<1x1x256xf32>
    %235 = vector.extract_strided_slice %229 {offsets = [0, 1, 0], sizes = [1, 1, 256], strides = [1, 1, 1]} : vector<1x2x256xf32> to vector<1x1x256xf32>
    %236 = vector.broadcast %231 : f32 to vector<1x1x256xf32>
    %237 = arith.mulf %236, %235 : vector<1x1x256xf32>
    %238 = arith.addf %234, %237 : vector<1x1x256xf32>
    %c0_59 = arith.constant 0 : index
    %c0_60 = arith.constant 0 : index
    %c95 = arith.constant 95 : index
    %239 = vector.load %arg4[%c0_59, %c0_60, %c95] : memref<1x2x512xf32, #tpu.memory_space<vmem>>, vector<1x2x256xf32>
    %c9 = arith.constant 9 : index
    %240 = memref.load %arg1[%c9] : memref<99xf32, #tpu.memory_space<smem>>
    %c58 = arith.constant 58 : index
    %241 = memref.load %arg1[%c58] : memref<99xf32, #tpu.memory_space<smem>>
    %242 = vector.extract_strided_slice %239 {offsets = [0, 0, 0], sizes = [1, 1, 256], strides = [1, 1, 1]} : vector<1x2x256xf32> to vector<1x1x256xf32>
    %243 = vector.broadcast %240 : f32 to vector<1x1x256xf32>
    %244 = arith.mulf %243, %242 : vector<1x1x256xf32>
    %245 = vector.extract_strided_slice %239 {offsets = [0, 1, 0], sizes = [1, 1, 256], strides = [1, 1, 1]} : vector<1x2x256xf32> to vector<1x1x256xf32>
    %246 = vector.broadcast %241 : f32 to vector<1x1x256xf32>
    %247 = arith.mulf %246, %245 : vector<1x1x256xf32>
    %248 = arith.addf %244, %247 : vector<1x1x256xf32>
    %249 = arith.addf %238, %248 : vector<1x1x256xf32>
    %c0_61 = arith.constant 0 : index
    %c0_62 = arith.constant 0 : index
    %c111 = arith.constant 111 : index
    %250 = vector.load %arg4[%c0_61, %c0_62, %c111] : memref<1x2x512xf32, #tpu.memory_space<vmem>>, vector<1x2x256xf32>
    %c16 = arith.constant 16 : index
    %251 = memref.load %arg1[%c16] : memref<99xf32, #tpu.memory_space<smem>>
    %c65 = arith.constant 65 : index
    %252 = memref.load %arg1[%c65] : memref<99xf32, #tpu.memory_space<smem>>
    %253 = vector.extract_strided_slice %250 {offsets = [0, 0, 0], sizes = [1, 1, 256], strides = [1, 1, 1]} : vector<1x2x256xf32> to vector<1x1x256xf32>
    %254 = vector.broadcast %251 : f32 to vector<1x1x256xf32>
    %255 = arith.mulf %254, %253 : vector<1x1x256xf32>
    %256 = vector.extract_strided_slice %250 {offsets = [0, 1, 0], sizes = [1, 1, 256], strides = [1, 1, 1]} : vector<1x2x256xf32> to vector<1x1x256xf32>
    %257 = vector.broadcast %252 : f32 to vector<1x1x256xf32>
    %258 = arith.mulf %257, %256 : vector<1x1x256xf32>
    %259 = arith.addf %255, %258 : vector<1x1x256xf32>
    %260 = arith.addf %249, %259 : vector<1x1x256xf32>
    %c0_63 = arith.constant 0 : index
    %c0_64 = arith.constant 0 : index
    %c127 = arith.constant 127 : index
    %261 = vector.load %arg4[%c0_63, %c0_64, %c127] : memref<1x2x512xf32, #tpu.memory_space<vmem>>, vector<1x2x256xf32>
    %c23 = arith.constant 23 : index
    %262 = memref.load %arg1[%c23] : memref<99xf32, #tpu.memory_space<smem>>
    %c72 = arith.constant 72 : index
    %263 = memref.load %arg1[%c72] : memref<99xf32, #tpu.memory_space<smem>>
    %264 = vector.extract_strided_slice %261 {offsets = [0, 0, 0], sizes = [1, 1, 256], strides = [1, 1, 1]} : vector<1x2x256xf32> to vector<1x1x256xf32>
    %265 = vector.broadcast %262 : f32 to vector<1x1x256xf32>
    %266 = arith.mulf %265, %264 : vector<1x1x256xf32>
    %267 = vector.extract_strided_slice %261 {offsets = [0, 1, 0], sizes = [1, 1, 256], strides = [1, 1, 1]} : vector<1x2x256xf32> to vector<1x1x256xf32>
    %268 = vector.broadcast %263 : f32 to vector<1x1x256xf32>
    %269 = arith.mulf %268, %267 : vector<1x1x256xf32>
    %270 = arith.addf %266, %269 : vector<1x1x256xf32>
    %271 = arith.addf %260, %270 : vector<1x1x256xf32>
    %c0_65 = arith.constant 0 : index
    %c0_66 = arith.constant 0 : index
    %c143 = arith.constant 143 : index
    %272 = vector.load %arg4[%c0_65, %c0_66, %c143] : memref<1x2x512xf32, #tpu.memory_space<vmem>>, vector<1x2x256xf32>
    %c30 = arith.constant 30 : index
    %273 = memref.load %arg1[%c30] : memref<99xf32, #tpu.memory_space<smem>>
    %c79_67 = arith.constant 79 : index
    %274 = memref.load %arg1[%c79_67] : memref<99xf32, #tpu.memory_space<smem>>
    %275 = vector.extract_strided_slice %272 {offsets = [0, 0, 0], sizes = [1, 1, 256], strides = [1, 1, 1]} : vector<1x2x256xf32> to vector<1x1x256xf32>
    %276 = vector.broadcast %273 : f32 to vector<1x1x256xf32>
    %277 = arith.mulf %276, %275 : vector<1x1x256xf32>
    %278 = vector.extract_strided_slice %272 {offsets = [0, 1, 0], sizes = [1, 1, 256], strides = [1, 1, 1]} : vector<1x2x256xf32> to vector<1x1x256xf32>
    %279 = vector.broadcast %274 : f32 to vector<1x1x256xf32>
    %280 = arith.mulf %279, %278 : vector<1x1x256xf32>
    %281 = arith.addf %277, %280 : vector<1x1x256xf32>
    %282 = arith.addf %271, %281 : vector<1x1x256xf32>
    %c0_68 = arith.constant 0 : index
    %c0_69 = arith.constant 0 : index
    %c159 = arith.constant 159 : index
    %283 = vector.load %arg4[%c0_68, %c0_69, %c159] : memref<1x2x512xf32, #tpu.memory_space<vmem>>, vector<1x2x256xf32>
    %c37 = arith.constant 37 : index
    %284 = memref.load %arg1[%c37] : memref<99xf32, #tpu.memory_space<smem>>
    %c86 = arith.constant 86 : index
    %285 = memref.load %arg1[%c86] : memref<99xf32, #tpu.memory_space<smem>>
    %286 = vector.extract_strided_slice %283 {offsets = [0, 0, 0], sizes = [1, 1, 256], strides = [1, 1, 1]} : vector<1x2x256xf32> to vector<1x1x256xf32>
    %287 = vector.broadcast %284 : f32 to vector<1x1x256xf32>
    %288 = arith.mulf %287, %286 : vector<1x1x256xf32>
    %289 = vector.extract_strided_slice %283 {offsets = [0, 1, 0], sizes = [1, 1, 256], strides = [1, 1, 1]} : vector<1x2x256xf32> to vector<1x1x256xf32>
    %290 = vector.broadcast %285 : f32 to vector<1x1x256xf32>
    %291 = arith.mulf %290, %289 : vector<1x1x256xf32>
    %292 = arith.addf %288, %291 : vector<1x1x256xf32>
    %293 = arith.addf %282, %292 : vector<1x1x256xf32>
    %c0_70 = arith.constant 0 : index
    %c0_71 = arith.constant 0 : index
    %c175 = arith.constant 175 : index
    %294 = vector.load %arg4[%c0_70, %c0_71, %c175] : memref<1x2x512xf32, #tpu.memory_space<vmem>>, vector<1x2x256xf32>
    %c44 = arith.constant 44 : index
    %295 = memref.load %arg1[%c44] : memref<99xf32, #tpu.memory_space<smem>>
    %c93_72 = arith.constant 93 : index
    %296 = memref.load %arg1[%c93_72] : memref<99xf32, #tpu.memory_space<smem>>
    %297 = vector.extract_strided_slice %294 {offsets = [0, 0, 0], sizes = [1, 1, 256], strides = [1, 1, 1]} : vector<1x2x256xf32> to vector<1x1x256xf32>
    %298 = vector.broadcast %295 : f32 to vector<1x1x256xf32>
    %299 = arith.mulf %298, %297 : vector<1x1x256xf32>
    %300 = vector.extract_strided_slice %294 {offsets = [0, 1, 0], sizes = [1, 1, 256], strides = [1, 1, 1]} : vector<1x2x256xf32> to vector<1x1x256xf32>
    %301 = vector.broadcast %296 : f32 to vector<1x1x256xf32>
    %302 = arith.mulf %301, %300 : vector<1x1x256xf32>
    %303 = arith.addf %299, %302 : vector<1x1x256xf32>
    %304 = arith.addf %293, %303 : vector<1x1x256xf32>
    %cst_73 = arith.constant 0.000000e+00 : f32
    %305 = vector.broadcast %cst_73 : f32 to vector<1x1x256xf32>
    %306 = arith.select %48, %304, %305 : vector<1x1x256xi1>, vector<1x1x256xf32>
    %307 = arith.addf %228, %306 : vector<1x1x256xf32>
    %c0_74 = arith.constant 0 : index
    %c0_75 = arith.constant 0 : index
    %c80 = arith.constant 80 : index
    %308 = vector.load %arg4[%c0_74, %c0_75, %c80] : memref<1x2x512xf32, #tpu.memory_space<vmem>>, vector<1x2x256xf32>
    %c3 = arith.constant 3 : index
    %309 = memref.load %arg1[%c3] : memref<99xf32, #tpu.memory_space<smem>>
    %c52 = arith.constant 52 : index
    %310 = memref.load %arg1[%c52] : memref<99xf32, #tpu.memory_space<smem>>
    %311 = vector.extract_strided_slice %308 {offsets = [0, 0, 0], sizes = [1, 1, 256], strides = [1, 1, 1]} : vector<1x2x256xf32> to vector<1x1x256xf32>
    %312 = vector.broadcast %309 : f32 to vector<1x1x256xf32>
    %313 = arith.mulf %312, %311 : vector<1x1x256xf32>
    %314 = vector.extract_strided_slice %308 {offsets = [0, 1, 0], sizes = [1, 1, 256], strides = [1, 1, 1]} : vector<1x2x256xf32> to vector<1x1x256xf32>
    %315 = vector.broadcast %310 : f32 to vector<1x1x256xf32>
    %316 = arith.mulf %315, %314 : vector<1x1x256xf32>
    %317 = arith.addf %313, %316 : vector<1x1x256xf32>
    %c0_76 = arith.constant 0 : index
    %c0_77 = arith.constant 0 : index
    %c96 = arith.constant 96 : index
    %318 = vector.load %arg4[%c0_76, %c0_77, %c96] : memref<1x2x512xf32, #tpu.memory_space<vmem>>, vector<1x2x256xf32>
    %c10 = arith.constant 10 : index
    %319 = memref.load %arg1[%c10] : memref<99xf32, #tpu.memory_space<smem>>
    %c59 = arith.constant 59 : index
    %320 = memref.load %arg1[%c59] : memref<99xf32, #tpu.memory_space<smem>>
    %321 = vector.extract_strided_slice %318 {offsets = [0, 0, 0], sizes = [1, 1, 256], strides = [1, 1, 1]} : vector<1x2x256xf32> to vector<1x1x256xf32>
    %322 = vector.broadcast %319 : f32 to vector<1x1x256xf32>
    %323 = arith.mulf %322, %321 : vector<1x1x256xf32>
    %324 = vector.extract_strided_slice %318 {offsets = [0, 1, 0], sizes = [1, 1, 256], strides = [1, 1, 1]} : vector<1x2x256xf32> to vector<1x1x256xf32>
    %325 = vector.broadcast %320 : f32 to vector<1x1x256xf32>
    %326 = arith.mulf %325, %324 : vector<1x1x256xf32>
    %327 = arith.addf %323, %326 : vector<1x1x256xf32>
    %328 = arith.addf %317, %327 : vector<1x1x256xf32>
    %c0_78 = arith.constant 0 : index
    %c0_79 = arith.constant 0 : index
    %c112 = arith.constant 112 : index
    %329 = vector.load %arg4[%c0_78, %c0_79, %c112] : memref<1x2x512xf32, #tpu.memory_space<vmem>>, vector<1x2x256xf32>
    %c17 = arith.constant 17 : index
    %330 = memref.load %arg1[%c17] : memref<99xf32, #tpu.memory_space<smem>>
    %c66 = arith.constant 66 : index
    %331 = memref.load %arg1[%c66] : memref<99xf32, #tpu.memory_space<smem>>
    %332 = vector.extract_strided_slice %329 {offsets = [0, 0, 0], sizes = [1, 1, 256], strides = [1, 1, 1]} : vector<1x2x256xf32> to vector<1x1x256xf32>
    %333 = vector.broadcast %330 : f32 to vector<1x1x256xf32>
    %334 = arith.mulf %333, %332 : vector<1x1x256xf32>
    %335 = vector.extract_strided_slice %329 {offsets = [0, 1, 0], sizes = [1, 1, 256], strides = [1, 1, 1]} : vector<1x2x256xf32> to vector<1x1x256xf32>
    %336 = vector.broadcast %331 : f32 to vector<1x1x256xf32>
    %337 = arith.mulf %336, %335 : vector<1x1x256xf32>
    %338 = arith.addf %334, %337 : vector<1x1x256xf32>
    %339 = arith.addf %328, %338 : vector<1x1x256xf32>
    %c0_80 = arith.constant 0 : index
    %c0_81 = arith.constant 0 : index
    %c128_82 = arith.constant 128 : index
    %340 = vector.load %arg4[%c0_80, %c0_81, %c128_82] : memref<1x2x512xf32, #tpu.memory_space<vmem>>, vector<1x2x256xf32>
    %c24 = arith.constant 24 : index
    %341 = memref.load %arg1[%c24] : memref<99xf32, #tpu.memory_space<smem>>
    %c73 = arith.constant 73 : index
    %342 = memref.load %arg1[%c73] : memref<99xf32, #tpu.memory_space<smem>>
    %343 = vector.extract_strided_slice %340 {offsets = [0, 0, 0], sizes = [1, 1, 256], strides = [1, 1, 1]} : vector<1x2x256xf32> to vector<1x1x256xf32>
    %344 = vector.broadcast %341 : f32 to vector<1x1x256xf32>
    %345 = arith.mulf %344, %343 : vector<1x1x256xf32>
    %346 = vector.extract_strided_slice %340 {offsets = [0, 1, 0], sizes = [1, 1, 256], strides = [1, 1, 1]} : vector<1x2x256xf32> to vector<1x1x256xf32>
    %347 = vector.broadcast %342 : f32 to vector<1x1x256xf32>
    %348 = arith.mulf %347, %346 : vector<1x1x256xf32>
    %349 = arith.addf %345, %348 : vector<1x1x256xf32>
    %350 = arith.addf %339, %349 : vector<1x1x256xf32>
    %c0_83 = arith.constant 0 : index
    %c0_84 = arith.constant 0 : index
    %c144 = arith.constant 144 : index
    %351 = vector.load %arg4[%c0_83, %c0_84, %c144] : memref<1x2x512xf32, #tpu.memory_space<vmem>>, vector<1x2x256xf32>
    %c31 = arith.constant 31 : index
    %352 = memref.load %arg1[%c31] : memref<99xf32, #tpu.memory_space<smem>>
    %c80_85 = arith.constant 80 : index
    %353 = memref.load %arg1[%c80_85] : memref<99xf32, #tpu.memory_space<smem>>
    %354 = vector.extract_strided_slice %351 {offsets = [0, 0, 0], sizes = [1, 1, 256], strides = [1, 1, 1]} : vector<1x2x256xf32> to vector<1x1x256xf32>
    %355 = vector.broadcast %352 : f32 to vector<1x1x256xf32>
    %356 = arith.mulf %355, %354 : vector<1x1x256xf32>
    %357 = vector.extract_strided_slice %351 {offsets = [0, 1, 0], sizes = [1, 1, 256], strides = [1, 1, 1]} : vector<1x2x256xf32> to vector<1x1x256xf32>
    %358 = vector.broadcast %353 : f32 to vector<1x1x256xf32>
    %359 = arith.mulf %358, %357 : vector<1x1x256xf32>
    %360 = arith.addf %356, %359 : vector<1x1x256xf32>
    %361 = arith.addf %350, %360 : vector<1x1x256xf32>
    %c0_86 = arith.constant 0 : index
    %c0_87 = arith.constant 0 : index
    %c160 = arith.constant 160 : index
    %362 = vector.load %arg4[%c0_86, %c0_87, %c160] : memref<1x2x512xf32, #tpu.memory_space<vmem>>, vector<1x2x256xf32>
    %c38 = arith.constant 38 : index
    %363 = memref.load %arg1[%c38] : memref<99xf32, #tpu.memory_space<smem>>
    %c87 = arith.constant 87 : index
    %364 = memref.load %arg1[%c87] : memref<99xf32, #tpu.memory_space<smem>>
    %365 = vector.extract_strided_slice %362 {offsets = [0, 0, 0], sizes = [1, 1, 256], strides = [1, 1, 1]} : vector<1x2x256xf32> to vector<1x1x256xf32>
    %366 = vector.broadcast %363 : f32 to vector<1x1x256xf32>
    %367 = arith.mulf %366, %365 : vector<1x1x256xf32>
    %368 = vector.extract_strided_slice %362 {offsets = [0, 1, 0], sizes = [1, 1, 256], strides = [1, 1, 1]} : vector<1x2x256xf32> to vector<1x1x256xf32>
    %369 = vector.broadcast %364 : f32 to vector<1x1x256xf32>
    %370 = arith.mulf %369, %368 : vector<1x1x256xf32>
    %371 = arith.addf %367, %370 : vector<1x1x256xf32>
    %372 = arith.addf %361, %371 : vector<1x1x256xf32>
    %c0_88 = arith.constant 0 : index
    %c0_89 = arith.constant 0 : index
    %c176 = arith.constant 176 : index
    %373 = vector.load %arg4[%c0_88, %c0_89, %c176] : memref<1x2x512xf32, #tpu.memory_space<vmem>>, vector<1x2x256xf32>
    %c45 = arith.constant 45 : index
    %374 = memref.load %arg1[%c45] : memref<99xf32, #tpu.memory_space<smem>>
    %c94_90 = arith.constant 94 : index
    %375 = memref.load %arg1[%c94_90] : memref<99xf32, #tpu.memory_space<smem>>
    %376 = vector.extract_strided_slice %373 {offsets = [0, 0, 0], sizes = [1, 1, 256], strides = [1, 1, 1]} : vector<1x2x256xf32> to vector<1x1x256xf32>
    %377 = vector.broadcast %374 : f32 to vector<1x1x256xf32>
    %378 = arith.mulf %377, %376 : vector<1x1x256xf32>
    %379 = vector.extract_strided_slice %373 {offsets = [0, 1, 0], sizes = [1, 1, 256], strides = [1, 1, 1]} : vector<1x2x256xf32> to vector<1x1x256xf32>
    %380 = vector.broadcast %375 : f32 to vector<1x1x256xf32>
    %381 = arith.mulf %380, %379 : vector<1x1x256xf32>
    %382 = arith.addf %378, %381 : vector<1x1x256xf32>
    %383 = arith.addf %372, %382 : vector<1x1x256xf32>
    %cst_91 = arith.constant 0.000000e+00 : f32
    %384 = vector.broadcast %cst_91 : f32 to vector<1x1x256xf32>
    %385 = arith.select %53, %383, %384 : vector<1x1x256xi1>, vector<1x1x256xf32>
    %386 = arith.addf %307, %385 : vector<1x1x256xf32>
    %c0_92 = arith.constant 0 : index
    %c0_93 = arith.constant 0 : index
    %c81 = arith.constant 81 : index
    %387 = vector.load %arg4[%c0_92, %c0_93, %c81] : memref<1x2x512xf32, #tpu.memory_space<vmem>>, vector<1x2x256xf32>
    %c4 = arith.constant 4 : index
    %388 = memref.load %arg1[%c4] : memref<99xf32, #tpu.memory_space<smem>>
    %c53 = arith.constant 53 : index
    %389 = memref.load %arg1[%c53] : memref<99xf32, #tpu.memory_space<smem>>
    %390 = vector.extract_strided_slice %387 {offsets = [0, 0, 0], sizes = [1, 1, 256], strides = [1, 1, 1]} : vector<1x2x256xf32> to vector<1x1x256xf32>
    %391 = vector.broadcast %388 : f32 to vector<1x1x256xf32>
    %392 = arith.mulf %391, %390 : vector<1x1x256xf32>
    %393 = vector.extract_strided_slice %387 {offsets = [0, 1, 0], sizes = [1, 1, 256], strides = [1, 1, 1]} : vector<1x2x256xf32> to vector<1x1x256xf32>
    %394 = vector.broadcast %389 : f32 to vector<1x1x256xf32>
    %395 = arith.mulf %394, %393 : vector<1x1x256xf32>
    %396 = arith.addf %392, %395 : vector<1x1x256xf32>
    %c0_94 = arith.constant 0 : index
    %c0_95 = arith.constant 0 : index
    %c97 = arith.constant 97 : index
    %397 = vector.load %arg4[%c0_94, %c0_95, %c97] : memref<1x2x512xf32, #tpu.memory_space<vmem>>, vector<1x2x256xf32>
    %c11 = arith.constant 11 : index
    %398 = memref.load %arg1[%c11] : memref<99xf32, #tpu.memory_space<smem>>
    %c60 = arith.constant 60 : index
    %399 = memref.load %arg1[%c60] : memref<99xf32, #tpu.memory_space<smem>>
    %400 = vector.extract_strided_slice %397 {offsets = [0, 0, 0], sizes = [1, 1, 256], strides = [1, 1, 1]} : vector<1x2x256xf32> to vector<1x1x256xf32>
    %401 = vector.broadcast %398 : f32 to vector<1x1x256xf32>
    %402 = arith.mulf %401, %400 : vector<1x1x256xf32>
    %403 = vector.extract_strided_slice %397 {offsets = [0, 1, 0], sizes = [1, 1, 256], strides = [1, 1, 1]} : vector<1x2x256xf32> to vector<1x1x256xf32>
    %404 = vector.broadcast %399 : f32 to vector<1x1x256xf32>
    %405 = arith.mulf %404, %403 : vector<1x1x256xf32>
    %406 = arith.addf %402, %405 : vector<1x1x256xf32>
    %407 = arith.addf %396, %406 : vector<1x1x256xf32>
    %c0_96 = arith.constant 0 : index
    %c0_97 = arith.constant 0 : index
    %c113 = arith.constant 113 : index
    %408 = vector.load %arg4[%c0_96, %c0_97, %c113] : memref<1x2x512xf32, #tpu.memory_space<vmem>>, vector<1x2x256xf32>
    %c18 = arith.constant 18 : index
    %409 = memref.load %arg1[%c18] : memref<99xf32, #tpu.memory_space<smem>>
    %c67 = arith.constant 67 : index
    %410 = memref.load %arg1[%c67] : memref<99xf32, #tpu.memory_space<smem>>
    %411 = vector.extract_strided_slice %408 {offsets = [0, 0, 0], sizes = [1, 1, 256], strides = [1, 1, 1]} : vector<1x2x256xf32> to vector<1x1x256xf32>
    %412 = vector.broadcast %409 : f32 to vector<1x1x256xf32>
    %413 = arith.mulf %412, %411 : vector<1x1x256xf32>
    %414 = vector.extract_strided_slice %408 {offsets = [0, 1, 0], sizes = [1, 1, 256], strides = [1, 1, 1]} : vector<1x2x256xf32> to vector<1x1x256xf32>
    %415 = vector.broadcast %410 : f32 to vector<1x1x256xf32>
    %416 = arith.mulf %415, %414 : vector<1x1x256xf32>
    %417 = arith.addf %413, %416 : vector<1x1x256xf32>
    %418 = arith.addf %407, %417 : vector<1x1x256xf32>
    %c0_98 = arith.constant 0 : index
    %c0_99 = arith.constant 0 : index
    %c129 = arith.constant 129 : index
    %419 = vector.load %arg4[%c0_98, %c0_99, %c129] : memref<1x2x512xf32, #tpu.memory_space<vmem>>, vector<1x2x256xf32>
    %c25 = arith.constant 25 : index
    %420 = memref.load %arg1[%c25] : memref<99xf32, #tpu.memory_space<smem>>
    %c74 = arith.constant 74 : index
    %421 = memref.load %arg1[%c74] : memref<99xf32, #tpu.memory_space<smem>>
    %422 = vector.extract_strided_slice %419 {offsets = [0, 0, 0], sizes = [1, 1, 256], strides = [1, 1, 1]} : vector<1x2x256xf32> to vector<1x1x256xf32>
    %423 = vector.broadcast %420 : f32 to vector<1x1x256xf32>
    %424 = arith.mulf %423, %422 : vector<1x1x256xf32>
    %425 = vector.extract_strided_slice %419 {offsets = [0, 1, 0], sizes = [1, 1, 256], strides = [1, 1, 1]} : vector<1x2x256xf32> to vector<1x1x256xf32>
    %426 = vector.broadcast %421 : f32 to vector<1x1x256xf32>
    %427 = arith.mulf %426, %425 : vector<1x1x256xf32>
    %428 = arith.addf %424, %427 : vector<1x1x256xf32>
    %429 = arith.addf %418, %428 : vector<1x1x256xf32>
    %c0_100 = arith.constant 0 : index
    %c0_101 = arith.constant 0 : index
    %c145 = arith.constant 145 : index
    %430 = vector.load %arg4[%c0_100, %c0_101, %c145] : memref<1x2x512xf32, #tpu.memory_space<vmem>>, vector<1x2x256xf32>
    %c32 = arith.constant 32 : index
    %431 = memref.load %arg1[%c32] : memref<99xf32, #tpu.memory_space<smem>>
    %c81_102 = arith.constant 81 : index
    %432 = memref.load %arg1[%c81_102] : memref<99xf32, #tpu.memory_space<smem>>
    %433 = vector.extract_strided_slice %430 {offsets = [0, 0, 0], sizes = [1, 1, 256], strides = [1, 1, 1]} : vector<1x2x256xf32> to vector<1x1x256xf32>
    %434 = vector.broadcast %431 : f32 to vector<1x1x256xf32>
    %435 = arith.mulf %434, %433 : vector<1x1x256xf32>
    %436 = vector.extract_strided_slice %430 {offsets = [0, 1, 0], sizes = [1, 1, 256], strides = [1, 1, 1]} : vector<1x2x256xf32> to vector<1x1x256xf32>
    %437 = vector.broadcast %432 : f32 to vector<1x1x256xf32>
    %438 = arith.mulf %437, %436 : vector<1x1x256xf32>
    %439 = arith.addf %435, %438 : vector<1x1x256xf32>
    %440 = arith.addf %429, %439 : vector<1x1x256xf32>
    %c0_103 = arith.constant 0 : index
    %c0_104 = arith.constant 0 : index
    %c161 = arith.constant 161 : index
    %441 = vector.load %arg4[%c0_103, %c0_104, %c161] : memref<1x2x512xf32, #tpu.memory_space<vmem>>, vector<1x2x256xf32>
    %c39 = arith.constant 39 : index
    %442 = memref.load %arg1[%c39] : memref<99xf32, #tpu.memory_space<smem>>
    %c88 = arith.constant 88 : index
    %443 = memref.load %arg1[%c88] : memref<99xf32, #tpu.memory_space<smem>>
    %444 = vector.extract_strided_slice %441 {offsets = [0, 0, 0], sizes = [1, 1, 256], strides = [1, 1, 1]} : vector<1x2x256xf32> to vector<1x1x256xf32>
    %445 = vector.broadcast %442 : f32 to vector<1x1x256xf32>
    %446 = arith.mulf %445, %444 : vector<1x1x256xf32>
    %447 = vector.extract_strided_slice %441 {offsets = [0, 1, 0], sizes = [1, 1, 256], strides = [1, 1, 1]} : vector<1x2x256xf32> to vector<1x1x256xf32>
    %448 = vector.broadcast %443 : f32 to vector<1x1x256xf32>
    %449 = arith.mulf %448, %447 : vector<1x1x256xf32>
    %450 = arith.addf %446, %449 : vector<1x1x256xf32>
    %451 = arith.addf %440, %450 : vector<1x1x256xf32>
    %c0_105 = arith.constant 0 : index
    %c0_106 = arith.constant 0 : index
    %c177 = arith.constant 177 : index
    %452 = vector.load %arg4[%c0_105, %c0_106, %c177] : memref<1x2x512xf32, #tpu.memory_space<vmem>>, vector<1x2x256xf32>
    %c46 = arith.constant 46 : index
    %453 = memref.load %arg1[%c46] : memref<99xf32, #tpu.memory_space<smem>>
    %c95_107 = arith.constant 95 : index
    %454 = memref.load %arg1[%c95_107] : memref<99xf32, #tpu.memory_space<smem>>
    %455 = vector.extract_strided_slice %452 {offsets = [0, 0, 0], sizes = [1, 1, 256], strides = [1, 1, 1]} : vector<1x2x256xf32> to vector<1x1x256xf32>
    %456 = vector.broadcast %453 : f32 to vector<1x1x256xf32>
    %457 = arith.mulf %456, %455 : vector<1x1x256xf32>
    %458 = vector.extract_strided_slice %452 {offsets = [0, 1, 0], sizes = [1, 1, 256], strides = [1, 1, 1]} : vector<1x2x256xf32> to vector<1x1x256xf32>
    %459 = vector.broadcast %454 : f32 to vector<1x1x256xf32>
    %460 = arith.mulf %459, %458 : vector<1x1x256xf32>
    %461 = arith.addf %457, %460 : vector<1x1x256xf32>
    %462 = arith.addf %451, %461 : vector<1x1x256xf32>
    %cst_108 = arith.constant 0.000000e+00 : f32
    %463 = vector.broadcast %cst_108 : f32 to vector<1x1x256xf32>
    %464 = arith.select %58, %462, %463 : vector<1x1x256xi1>, vector<1x1x256xf32>
    %465 = arith.addf %386, %464 : vector<1x1x256xf32>
    %c0_109 = arith.constant 0 : index
    %c0_110 = arith.constant 0 : index
    %c82 = arith.constant 82 : index
    %466 = vector.load %arg4[%c0_109, %c0_110, %c82] : memref<1x2x512xf32, #tpu.memory_space<vmem>>, vector<1x2x256xf32>
    %c5 = arith.constant 5 : index
    %467 = memref.load %arg1[%c5] : memref<99xf32, #tpu.memory_space<smem>>
    %c54 = arith.constant 54 : index
    %468 = memref.load %arg1[%c54] : memref<99xf32, #tpu.memory_space<smem>>
    %469 = vector.extract_strided_slice %466 {offsets = [0, 0, 0], sizes = [1, 1, 256], strides = [1, 1, 1]} : vector<1x2x256xf32> to vector<1x1x256xf32>
    %470 = vector.broadcast %467 : f32 to vector<1x1x256xf32>
    %471 = arith.mulf %470, %469 : vector<1x1x256xf32>
    %472 = vector.extract_strided_slice %466 {offsets = [0, 1, 0], sizes = [1, 1, 256], strides = [1, 1, 1]} : vector<1x2x256xf32> to vector<1x1x256xf32>
    %473 = vector.broadcast %468 : f32 to vector<1x1x256xf32>
    %474 = arith.mulf %473, %472 : vector<1x1x256xf32>
    %475 = arith.addf %471, %474 : vector<1x1x256xf32>
    %c0_111 = arith.constant 0 : index
    %c0_112 = arith.constant 0 : index
    %c98_113 = arith.constant 98 : index
    %476 = vector.load %arg4[%c0_111, %c0_112, %c98_113] : memref<1x2x512xf32, #tpu.memory_space<vmem>>, vector<1x2x256xf32>
    %c12 = arith.constant 12 : index
    %477 = memref.load %arg1[%c12] : memref<99xf32, #tpu.memory_space<smem>>
    %c61 = arith.constant 61 : index
    %478 = memref.load %arg1[%c61] : memref<99xf32, #tpu.memory_space<smem>>
    %479 = vector.extract_strided_slice %476 {offsets = [0, 0, 0], sizes = [1, 1, 256], strides = [1, 1, 1]} : vector<1x2x256xf32> to vector<1x1x256xf32>
    %480 = vector.broadcast %477 : f32 to vector<1x1x256xf32>
    %481 = arith.mulf %480, %479 : vector<1x1x256xf32>
    %482 = vector.extract_strided_slice %476 {offsets = [0, 1, 0], sizes = [1, 1, 256], strides = [1, 1, 1]} : vector<1x2x256xf32> to vector<1x1x256xf32>
    %483 = vector.broadcast %478 : f32 to vector<1x1x256xf32>
    %484 = arith.mulf %483, %482 : vector<1x1x256xf32>
    %485 = arith.addf %481, %484 : vector<1x1x256xf32>
    %486 = arith.addf %475, %485 : vector<1x1x256xf32>
    %c0_114 = arith.constant 0 : index
    %c0_115 = arith.constant 0 : index
    %c114 = arith.constant 114 : index
    %487 = vector.load %arg4[%c0_114, %c0_115, %c114] : memref<1x2x512xf32, #tpu.memory_space<vmem>>, vector<1x2x256xf32>
    %c19 = arith.constant 19 : index
    %488 = memref.load %arg1[%c19] : memref<99xf32, #tpu.memory_space<smem>>
    %c68 = arith.constant 68 : index
    %489 = memref.load %arg1[%c68] : memref<99xf32, #tpu.memory_space<smem>>
    %490 = vector.extract_strided_slice %487 {offsets = [0, 0, 0], sizes = [1, 1, 256], strides = [1, 1, 1]} : vector<1x2x256xf32> to vector<1x1x256xf32>
    %491 = vector.broadcast %488 : f32 to vector<1x1x256xf32>
    %492 = arith.mulf %491, %490 : vector<1x1x256xf32>
    %493 = vector.extract_strided_slice %487 {offsets = [0, 1, 0], sizes = [1, 1, 256], strides = [1, 1, 1]} : vector<1x2x256xf32> to vector<1x1x256xf32>
    %494 = vector.broadcast %489 : f32 to vector<1x1x256xf32>
    %495 = arith.mulf %494, %493 : vector<1x1x256xf32>
    %496 = arith.addf %492, %495 : vector<1x1x256xf32>
    %497 = arith.addf %486, %496 : vector<1x1x256xf32>
    %c0_116 = arith.constant 0 : index
    %c0_117 = arith.constant 0 : index
    %c130 = arith.constant 130 : index
    %498 = vector.load %arg4[%c0_116, %c0_117, %c130] : memref<1x2x512xf32, #tpu.memory_space<vmem>>, vector<1x2x256xf32>
    %c26 = arith.constant 26 : index
    %499 = memref.load %arg1[%c26] : memref<99xf32, #tpu.memory_space<smem>>
    %c75 = arith.constant 75 : index
    %500 = memref.load %arg1[%c75] : memref<99xf32, #tpu.memory_space<smem>>
    %501 = vector.extract_strided_slice %498 {offsets = [0, 0, 0], sizes = [1, 1, 256], strides = [1, 1, 1]} : vector<1x2x256xf32> to vector<1x1x256xf32>
    %502 = vector.broadcast %499 : f32 to vector<1x1x256xf32>
    %503 = arith.mulf %502, %501 : vector<1x1x256xf32>
    %504 = vector.extract_strided_slice %498 {offsets = [0, 1, 0], sizes = [1, 1, 256], strides = [1, 1, 1]} : vector<1x2x256xf32> to vector<1x1x256xf32>
    %505 = vector.broadcast %500 : f32 to vector<1x1x256xf32>
    %506 = arith.mulf %505, %504 : vector<1x1x256xf32>
    %507 = arith.addf %503, %506 : vector<1x1x256xf32>
    %508 = arith.addf %497, %507 : vector<1x1x256xf32>
    %c0_118 = arith.constant 0 : index
    %c0_119 = arith.constant 0 : index
    %c146 = arith.constant 146 : index
    %509 = vector.load %arg4[%c0_118, %c0_119, %c146] : memref<1x2x512xf32, #tpu.memory_space<vmem>>, vector<1x2x256xf32>
    %c33 = arith.constant 33 : index
    %510 = memref.load %arg1[%c33] : memref<99xf32, #tpu.memory_space<smem>>
    %c82_120 = arith.constant 82 : index
    %511 = memref.load %arg1[%c82_120] : memref<99xf32, #tpu.memory_space<smem>>
    %512 = vector.extract_strided_slice %509 {offsets = [0, 0, 0], sizes = [1, 1, 256], strides = [1, 1, 1]} : vector<1x2x256xf32> to vector<1x1x256xf32>
    %513 = vector.broadcast %510 : f32 to vector<1x1x256xf32>
    %514 = arith.mulf %513, %512 : vector<1x1x256xf32>
    %515 = vector.extract_strided_slice %509 {offsets = [0, 1, 0], sizes = [1, 1, 256], strides = [1, 1, 1]} : vector<1x2x256xf32> to vector<1x1x256xf32>
    %516 = vector.broadcast %511 : f32 to vector<1x1x256xf32>
    %517 = arith.mulf %516, %515 : vector<1x1x256xf32>
    %518 = arith.addf %514, %517 : vector<1x1x256xf32>
    %519 = arith.addf %508, %518 : vector<1x1x256xf32>
    %c0_121 = arith.constant 0 : index
    %c0_122 = arith.constant 0 : index
    %c162 = arith.constant 162 : index
    %520 = vector.load %arg4[%c0_121, %c0_122, %c162] : memref<1x2x512xf32, #tpu.memory_space<vmem>>, vector<1x2x256xf32>
    %c40 = arith.constant 40 : index
    %521 = memref.load %arg1[%c40] : memref<99xf32, #tpu.memory_space<smem>>
    %c89 = arith.constant 89 : index
    %522 = memref.load %arg1[%c89] : memref<99xf32, #tpu.memory_space<smem>>
    %523 = vector.extract_strided_slice %520 {offsets = [0, 0, 0], sizes = [1, 1, 256], strides = [1, 1, 1]} : vector<1x2x256xf32> to vector<1x1x256xf32>
    %524 = vector.broadcast %521 : f32 to vector<1x1x256xf32>
    %525 = arith.mulf %524, %523 : vector<1x1x256xf32>
    %526 = vector.extract_strided_slice %520 {offsets = [0, 1, 0], sizes = [1, 1, 256], strides = [1, 1, 1]} : vector<1x2x256xf32> to vector<1x1x256xf32>
    %527 = vector.broadcast %522 : f32 to vector<1x1x256xf32>
    %528 = arith.mulf %527, %526 : vector<1x1x256xf32>
    %529 = arith.addf %525, %528 : vector<1x1x256xf32>
    %530 = arith.addf %519, %529 : vector<1x1x256xf32>
    %c0_123 = arith.constant 0 : index
    %c0_124 = arith.constant 0 : index
    %c178 = arith.constant 178 : index
    %531 = vector.load %arg4[%c0_123, %c0_124, %c178] : memref<1x2x512xf32, #tpu.memory_space<vmem>>, vector<1x2x256xf32>
    %c47 = arith.constant 47 : index
    %532 = memref.load %arg1[%c47] : memref<99xf32, #tpu.memory_space<smem>>
    %c96_125 = arith.constant 96 : index
    %533 = memref.load %arg1[%c96_125] : memref<99xf32, #tpu.memory_space<smem>>
    %534 = vector.extract_strided_slice %531 {offsets = [0, 0, 0], sizes = [1, 1, 256], strides = [1, 1, 1]} : vector<1x2x256xf32> to vector<1x1x256xf32>
    %535 = vector.broadcast %532 : f32 to vector<1x1x256xf32>
    %536 = arith.mulf %535, %534 : vector<1x1x256xf32>
    %537 = vector.extract_strided_slice %531 {offsets = [0, 1, 0], sizes = [1, 1, 256], strides = [1, 1, 1]} : vector<1x2x256xf32> to vector<1x1x256xf32>
    %538 = vector.broadcast %533 : f32 to vector<1x1x256xf32>
    %539 = arith.mulf %538, %537 : vector<1x1x256xf32>
    %540 = arith.addf %536, %539 : vector<1x1x256xf32>
    %541 = arith.addf %530, %540 : vector<1x1x256xf32>
    %cst_126 = arith.constant 0.000000e+00 : f32
    %542 = vector.broadcast %cst_126 : f32 to vector<1x1x256xf32>
    %543 = arith.select %63, %541, %542 : vector<1x1x256xi1>, vector<1x1x256xf32>
    %544 = arith.addf %465, %543 : vector<1x1x256xf32>
    %c0_127 = arith.constant 0 : index
    %c0_128 = arith.constant 0 : index
    %c83 = arith.constant 83 : index
    %545 = vector.load %arg4[%c0_127, %c0_128, %c83] : memref<1x2x512xf32, #tpu.memory_space<vmem>>, vector<1x2x256xf32>
    %c6 = arith.constant 6 : index
    %546 = memref.load %arg1[%c6] : memref<99xf32, #tpu.memory_space<smem>>
    %c55 = arith.constant 55 : index
    %547 = memref.load %arg1[%c55] : memref<99xf32, #tpu.memory_space<smem>>
    %548 = vector.extract_strided_slice %545 {offsets = [0, 0, 0], sizes = [1, 1, 256], strides = [1, 1, 1]} : vector<1x2x256xf32> to vector<1x1x256xf32>
    %549 = vector.broadcast %546 : f32 to vector<1x1x256xf32>
    %550 = arith.mulf %549, %548 : vector<1x1x256xf32>
    %551 = vector.extract_strided_slice %545 {offsets = [0, 1, 0], sizes = [1, 1, 256], strides = [1, 1, 1]} : vector<1x2x256xf32> to vector<1x1x256xf32>
    %552 = vector.broadcast %547 : f32 to vector<1x1x256xf32>
    %553 = arith.mulf %552, %551 : vector<1x1x256xf32>
    %554 = arith.addf %550, %553 : vector<1x1x256xf32>
    %c0_129 = arith.constant 0 : index
    %c0_130 = arith.constant 0 : index
    %c99 = arith.constant 99 : index
    %555 = vector.load %arg4[%c0_129, %c0_130, %c99] : memref<1x2x512xf32, #tpu.memory_space<vmem>>, vector<1x2x256xf32>
    %c13 = arith.constant 13 : index
    %556 = memref.load %arg1[%c13] : memref<99xf32, #tpu.memory_space<smem>>
    %c62 = arith.constant 62 : index
    %557 = memref.load %arg1[%c62] : memref<99xf32, #tpu.memory_space<smem>>
    %558 = vector.extract_strided_slice %555 {offsets = [0, 0, 0], sizes = [1, 1, 256], strides = [1, 1, 1]} : vector<1x2x256xf32> to vector<1x1x256xf32>
    %559 = vector.broadcast %556 : f32 to vector<1x1x256xf32>
    %560 = arith.mulf %559, %558 : vector<1x1x256xf32>
    %561 = vector.extract_strided_slice %555 {offsets = [0, 1, 0], sizes = [1, 1, 256], strides = [1, 1, 1]} : vector<1x2x256xf32> to vector<1x1x256xf32>
    %562 = vector.broadcast %557 : f32 to vector<1x1x256xf32>
    %563 = arith.mulf %562, %561 : vector<1x1x256xf32>
    %564 = arith.addf %560, %563 : vector<1x1x256xf32>
    %565 = arith.addf %554, %564 : vector<1x1x256xf32>
    %c0_131 = arith.constant 0 : index
    %c0_132 = arith.constant 0 : index
    %c115 = arith.constant 115 : index
    %566 = vector.load %arg4[%c0_131, %c0_132, %c115] : memref<1x2x512xf32, #tpu.memory_space<vmem>>, vector<1x2x256xf32>
    %c20 = arith.constant 20 : index
    %567 = memref.load %arg1[%c20] : memref<99xf32, #tpu.memory_space<smem>>
    %c69 = arith.constant 69 : index
    %568 = memref.load %arg1[%c69] : memref<99xf32, #tpu.memory_space<smem>>
    %569 = vector.extract_strided_slice %566 {offsets = [0, 0, 0], sizes = [1, 1, 256], strides = [1, 1, 1]} : vector<1x2x256xf32> to vector<1x1x256xf32>
    %570 = vector.broadcast %567 : f32 to vector<1x1x256xf32>
    %571 = arith.mulf %570, %569 : vector<1x1x256xf32>
    %572 = vector.extract_strided_slice %566 {offsets = [0, 1, 0], sizes = [1, 1, 256], strides = [1, 1, 1]} : vector<1x2x256xf32> to vector<1x1x256xf32>
    %573 = vector.broadcast %568 : f32 to vector<1x1x256xf32>
    %574 = arith.mulf %573, %572 : vector<1x1x256xf32>
    %575 = arith.addf %571, %574 : vector<1x1x256xf32>
    %576 = arith.addf %565, %575 : vector<1x1x256xf32>
    %c0_133 = arith.constant 0 : index
    %c0_134 = arith.constant 0 : index
    %c131 = arith.constant 131 : index
    %577 = vector.load %arg4[%c0_133, %c0_134, %c131] : memref<1x2x512xf32, #tpu.memory_space<vmem>>, vector<1x2x256xf32>
    %c27 = arith.constant 27 : index
    %578 = memref.load %arg1[%c27] : memref<99xf32, #tpu.memory_space<smem>>
    %c76 = arith.constant 76 : index
    %579 = memref.load %arg1[%c76] : memref<99xf32, #tpu.memory_space<smem>>
    %580 = vector.extract_strided_slice %577 {offsets = [0, 0, 0], sizes = [1, 1, 256], strides = [1, 1, 1]} : vector<1x2x256xf32> to vector<1x1x256xf32>
    %581 = vector.broadcast %578 : f32 to vector<1x1x256xf32>
    %582 = arith.mulf %581, %580 : vector<1x1x256xf32>
    %583 = vector.extract_strided_slice %577 {offsets = [0, 1, 0], sizes = [1, 1, 256], strides = [1, 1, 1]} : vector<1x2x256xf32> to vector<1x1x256xf32>
    %584 = vector.broadcast %579 : f32 to vector<1x1x256xf32>
    %585 = arith.mulf %584, %583 : vector<1x1x256xf32>
    %586 = arith.addf %582, %585 : vector<1x1x256xf32>
    %587 = arith.addf %576, %586 : vector<1x1x256xf32>
    %c0_135 = arith.constant 0 : index
    %c0_136 = arith.constant 0 : index
    %c147 = arith.constant 147 : index
    %588 = vector.load %arg4[%c0_135, %c0_136, %c147] : memref<1x2x512xf32, #tpu.memory_space<vmem>>, vector<1x2x256xf32>
    %c34 = arith.constant 34 : index
    %589 = memref.load %arg1[%c34] : memref<99xf32, #tpu.memory_space<smem>>
    %c83_137 = arith.constant 83 : index
    %590 = memref.load %arg1[%c83_137] : memref<99xf32, #tpu.memory_space<smem>>
    %591 = vector.extract_strided_slice %588 {offsets = [0, 0, 0], sizes = [1, 1, 256], strides = [1, 1, 1]} : vector<1x2x256xf32> to vector<1x1x256xf32>
    %592 = vector.broadcast %589 : f32 to vector<1x1x256xf32>
    %593 = arith.mulf %592, %591 : vector<1x1x256xf32>
    %594 = vector.extract_strided_slice %588 {offsets = [0, 1, 0], sizes = [1, 1, 256], strides = [1, 1, 1]} : vector<1x2x256xf32> to vector<1x1x256xf32>
    %595 = vector.broadcast %590 : f32 to vector<1x1x256xf32>
    %596 = arith.mulf %595, %594 : vector<1x1x256xf32>
    %597 = arith.addf %593, %596 : vector<1x1x256xf32>
    %598 = arith.addf %587, %597 : vector<1x1x256xf32>
    %c0_138 = arith.constant 0 : index
    %c0_139 = arith.constant 0 : index
    %c163 = arith.constant 163 : index
    %599 = vector.load %arg4[%c0_138, %c0_139, %c163] : memref<1x2x512xf32, #tpu.memory_space<vmem>>, vector<1x2x256xf32>
    %c41 = arith.constant 41 : index
    %600 = memref.load %arg1[%c41] : memref<99xf32, #tpu.memory_space<smem>>
    %c90 = arith.constant 90 : index
    %601 = memref.load %arg1[%c90] : memref<99xf32, #tpu.memory_space<smem>>
    %602 = vector.extract_strided_slice %599 {offsets = [0, 0, 0], sizes = [1, 1, 256], strides = [1, 1, 1]} : vector<1x2x256xf32> to vector<1x1x256xf32>
    %603 = vector.broadcast %600 : f32 to vector<1x1x256xf32>
    %604 = arith.mulf %603, %602 : vector<1x1x256xf32>
    %605 = vector.extract_strided_slice %599 {offsets = [0, 1, 0], sizes = [1, 1, 256], strides = [1, 1, 1]} : vector<1x2x256xf32> to vector<1x1x256xf32>
    %606 = vector.broadcast %601 : f32 to vector<1x1x256xf32>
    %607 = arith.mulf %606, %605 : vector<1x1x256xf32>
    %608 = arith.addf %604, %607 : vector<1x1x256xf32>
    %609 = arith.addf %598, %608 : vector<1x1x256xf32>
    %c0_140 = arith.constant 0 : index
    %c0_141 = arith.constant 0 : index
    %c179 = arith.constant 179 : index
    %610 = vector.load %arg4[%c0_140, %c0_141, %c179] : memref<1x2x512xf32, #tpu.memory_space<vmem>>, vector<1x2x256xf32>
    %c48 = arith.constant 48 : index
    %611 = memref.load %arg1[%c48] : memref<99xf32, #tpu.memory_space<smem>>
    %c97_142 = arith.constant 97 : index
    %612 = memref.load %arg1[%c97_142] : memref<99xf32, #tpu.memory_space<smem>>
    %613 = vector.extract_strided_slice %610 {offsets = [0, 0, 0], sizes = [1, 1, 256], strides = [1, 1, 1]} : vector<1x2x256xf32> to vector<1x1x256xf32>
    %614 = vector.broadcast %611 : f32 to vector<1x1x256xf32>
    %615 = arith.mulf %614, %613 : vector<1x1x256xf32>
    %616 = vector.extract_strided_slice %610 {offsets = [0, 1, 0], sizes = [1, 1, 256], strides = [1, 1, 1]} : vector<1x2x256xf32> to vector<1x1x256xf32>
    %617 = vector.broadcast %612 : f32 to vector<1x1x256xf32>
    %618 = arith.mulf %617, %616 : vector<1x1x256xf32>
    %619 = arith.addf %615, %618 : vector<1x1x256xf32>
    %620 = arith.addf %609, %619 : vector<1x1x256xf32>
    %cst_143 = arith.constant 0.000000e+00 : f32
    %621 = vector.broadcast %cst_143 : f32 to vector<1x1x256xf32>
    %622 = arith.select %68, %620, %621 : vector<1x1x256xi1>, vector<1x1x256xf32>
    %623 = arith.addf %544, %622 : vector<1x1x256xf32>
    %624 = arith.negf %623 : vector<1x1x256xf32>
    %625 = math.exp %624 : vector<1x1x256xf32>
    %cst_144 = arith.constant 1.000000e+00 : f32
    %626 = vector.broadcast %cst_144 : f32 to vector<1x1x256xf32>
    %627 = arith.addf %626, %625 : vector<1x1x256xf32>
    %628 = arith.divf %626, %627 : vector<1x1x256xf32>
    %629 = vector.shape_cast %628 : vector<1x1x256xf32> to vector<1x1x256xf32>
    %630 = vector.broadcast %629 : vector<1x1x256xf32> to vector<1x4x256xf32>
    %c0_145 = arith.constant 0 : index
    %c0_146 = arith.constant 0 : index
    %c0_147 = arith.constant 0 : index
    %631 = vector.load %arg2[%c0_145, %c0_146, %c0_147] : memref<1x4x256xf32, #tpu.memory_space<vmem>>, vector<1x4x256xf32>
    %632 = arith.mulf %631, %630 : vector<1x4x256xf32>
    %c0_148 = arith.constant 0 : index
    %c0_149 = arith.constant 0 : index
    %c0_150 = arith.constant 0 : index
    %633 = vector.load %arg3[%c0_148, %c0_149, %c0_150] : memref<1x4x256xf32, #tpu.memory_space<vmem>>, vector<1x4x256xf32>
    tpu.vector_store %arg3[%c0_148, %c0_149, %c0_150], %632 {strides = array<i32>} : memref<1x4x256xf32, #tpu.memory_space<vmem>>, vector<1x4x256xf32>,
    return
  }
  func.func @transform_0(%arg0: i32) -> i32 {
    %c0_i32 = arith.constant 0 : i32
    %c0_i32_0 = arith.constant 0 : i32
    return %c0_i32 : i32
  }
  func.func @transform_1(%arg0: i32) -> (i32, i32, i32) {
    %c0_i32 = arith.constant 0 : i32
    %c0_i32_0 = arith.constant 0 : i32
    %c0_i32_1 = arith.constant 0 : i32
    return %arg0, %c0_i32, %c0_i32_0 : i32, i32, i32
  }
  func.func @transform_2(%arg0: i32) -> (i32, i32, i32) {
    %c0_i32 = arith.constant 0 : i32
    %c0_i32_0 = arith.constant 0 : i32
    %c0_i32_1 = arith.constant 0 : i32
    return %arg0, %c0_i32, %c0_i32_0 : i32, i32, i32
  }
}

</mosaic_0001>

<bundles_post_ra>
// kernel: tpu_custom_call.1
= control target key start
LH: loop header
LB: loop body
LE: loop exit
PB: predicated region body
PF: predicated region fallthrough
CT: control target
= control target key end

     0   :  { %7 = vsyncpa [#allocation6], 0  ;;  %s2495_s0 = inlined_call_operand.hbm [shape: f32[99], index: 0, kind: input, shape index: {}]   ;;  %s2496_s1 = inlined_call_operand.hbm [shape: f32[2,4,256], index: 1, kind: input, shape index: {}]   ;;  %s2497_s2 = inlined_call_operand.hbm [shape: f32[2,4,256], index: 2, kind: output, shape index: {}]  }
   0x1   :  { %8 = vsyncpa [#allocation4], 0 }
   0x2   :  { %10 = vsyncpa [#allocation4 + $0x1], 0 }
   0x3   :  { %11 = vsyncpa [#allocation5], 0 }
   0x4   :  { %13 = vsyncpa [#allocation5 + $0x1], 0  ;;  %s1826_s9 = smov 0   ;;  %s1828_s10 = smov 0  }
   0x5   :  { %s1830_s11 = smov 0   ;;  %s1832_s12 = smov 0  }
   0x6 LB: > { %s1847_s13 = sadd.s32 4294967295, %s1795_s12   ;;  %s1434_s14 = sadd.s32 4294967294, %s1795_s12   ;;  %s1795_s12 = sphi %s1832_s12, %s2509_s12   ;;  %s1791_s11 = sphi %s1830_s11, %s2508_s11   ;;  %s1787_s10 = sphi %s1828_s10, %s2507_s10   ;;  %s1783_s9 = sphi %s1826_s9, %s2506_s9  }
   0x7   : > { %p60_p0 = scmp.ne.s32.totalorder %s1787_s10, %s1783_s9  ;;  %p61_p1 = scmp.eq.s32.totalorder %s1847_s13, 0 }
   0x8   : > { %p84_p2 = scmp.eq.s32.totalorder %s1847_s13, 1  ;;  %p90_p3 = scmp.eq.s32.totalorder %s1434_s14, 1 }
   0x9   : > { %p1856_p4 = por %p61_p1, %p60_p0  ;;  %p1435_p5 = scmp.ge.s32.totalorder %s1795_s12, 1 }
   0xa   : > { %p1861_p6 = por %p90_p3, %p60_p0  ;;  %p97_p7 = scmp.lt.s32.totalorder %s1795_s12, 3 }
   0xb   : > { %s109_s19 = sshll.u32 %s2495_s0, 4  ;;  %s1877_s21 = sadd.s32 1, %s1795_s12   ;;  %s110_s19 = int_to_ptr.hbm [resolvable:$true] %s109_s19 }
   0xc   : > { %p1869_p8 = pnand %p1435_p5, %p97_p7  ;;  %s44_s22 = ssub.s32 %s1795_s12, %s1877_s21 }
   0xd   : > { %p45_p12 = scmp.eq.s32.totalorder %s44_s22, 0  ;;  %s47_s23 = sadd.s32 1, %s1791_s11 }
   0xe   : > { %p1609_p10 = pneg %p1869_p8  ;;  %p54_p13 = scmp.ne.s32.totalorder %s1791_s11, %s1787_s10 }
   0xf   : > { %s1797_s24 = smov [#allocation3]   ;;  %p55_p0 = scmp.eq.s32.totalorder %s1795_s12, 0 }
  0x10   : > { %p1610_p11 = pnand %p1609_p10, %p61_p1  ;;  %p1892_p3 = por %p84_p2, %p54_p13 }
  0x11   : > { %s1887_s25 = scalar_select %p45_p12, %s1791_s11, %s47_s23  }
  0x12   : > { %1612 = dma.hbm_to_smem (!%p1610_p11), %s110_s19, 16, %s1797_s24, [#allocation6]  }
  0x13   : > { %s120_s27 = sand.u32 1, %s1791_s11   ;;  %p56_p5 = por %p55_p0, %p54_p13 }
  0x14   : > { %p1622_p7 = scmp.lt.s32.totalorder %s1795_s12, 2  ;;  %s1438_s28 = sshll.u32 %s120_s27, 3 }
  0x15   : > { %s1599_s29 = sshll.u32 %s1795_s12, 3  ;;  %s124_s6 = scalar_lea.vmem [#allocation7], %s1438_s28 }
  0x16   : > { %s129_s4 = scalar_lea.hbm %s2496_s1, %s1599_s29  ;;  %s133_s7 = sshll.u32 %s124_s6, 4  ;;  %s134_s7 = int_to_ptr.vmem [resolvable:$true] %s133_s7 }
  0x17   : > { %s131_s5 = sshll.u32 %s129_s4, 4  ;;  %p1902_p10 = pnand %p1622_p7, %p56_p5  ;;  %s132_s5 = int_to_ptr.hbm [resolvable:$true] %s131_s5 }
  0x18   : > { %s121_s14 = scalar_lea.sflag [#allocation4], %s120_s27  ;;  %s1695_s17 = sshra.s32 %s132_s5, 4  ;;  %s1696_s17 = int_to_ptr.hbm [resolvable:$true] %s1695_s17 }
  0x19   : > { %s1697_s18 = scalar_lea.hbm %s1696_s17, 8  ;;  %p1699_p11 = pneg %p1902_p10 }
  0x1a   : > { %p1698_p2 = scmp.ne.s32.totalorder %s1696_s17, %s1697_s18  ;;  %s1702_s23 = scalar_lea.hbm %s2496_s1, 16 }
  0x1b   : > { %p1703_p0 = scmp.lt.s32.totalorder %s1696_s17, %s2496_s1  ;;  %p1704_p5 = scmp.lt.s32.totalorder %s1702_s23, %s1697_s18 }
  0x1c   : > { %p1700_p12 = pnand %p1699_p11, %p1698_p2 }
  0x1d   : > { %p1705_p7 = por %p1704_p5, %p1703_p0 }
  0x1e   : > { %p1701_p13 = pneg %p1700_p12 }
  0x20   : > { %p1706_p9 = pnand %p1705_p7, %p1701_p13 }
  0x22   : > { %1709 = shalt.err (!%p1706_p9)
}
  0x23   : > { %1616 = dma.hbm_to_vmem [thread:$0]  (!%p1902_p10), %s132_s5, 128, %s134_s7, %s121_s14  }
  0x24   : > { %142 = sbr.rel (%p1869_p8) target bundleno = 488 (0x1e8), region = 28 }
  0x29   : > { %1770 = dma.done.wait (%p61_p1), [#allocation6], 16  }
  0x2a   : > { %1772 = vsyncadd (%p61_p1), [#allocation6], 4294967280  ;;  %s1923_s27 = sand.u32 1, %s1787_s10  }
  0x2b   : > { %s1443_s29 = sshll.u32 %s1923_s27, 3  ;;  %s150_s30 = scalar_lea.sflag [#allocation4], %s1923_s27 }
  0x2c   : > { %s1929_s3 = scalar_lea.vmem [#allocation7], %s1443_s29 }
  0x2d   : > { %1774 = dma.done.wait (%p1856_p4), %s150_s30, 128  }
  0x2e   : > { %1776 = vsyncadd (%p1856_p4), %s150_s30, 4294967168 }
  0x2f   : > { %159 = sfence }
  0x30   : > { %v176_v0 = vld [vmem:[%s1929_s3] sm:$0xff]  ;;  %v1798_v1 = vmov 0.0   ;;  %vm183_vm0 = vcmask 1043456   ;;  %v229_v22 = vlaneseq  ;;  %vm226_vm1 = vcmask 1040384   ;;  %s1945_s15 = sld [smem:[#allocation3 + $0x15]] }
  0x31   : > { %178 = vst [vmem:[#allocation1] ss:$2 sm:$0xff] %v176_v0  ;;  %s1455_s20 = sld [smem:[#allocation3 + $0x46]]  ;;  %vm340_vm3 = vcmask 916480   ;;  %vm359_vm4 = vcmask 785408   ;;  %vm378_vm5 = vcmask 654336  }
  0x32   : > { %221 = vst [vmem:[#allocation2] sm:$0x3] %v1798_v1  ;;  %vm1941_vm2 = vcmp.lt.s32.totalorder %v229_v22, 256  ;;  %s1448_s4 = sld [smem:[#allocation3 + $0x7]]  ;;  %vm398_vm6 = vcmask 523264   ;;  %vm417_vm7 = vcmask 392192  }
  0x33   : > { %222 = vst [vmem:[#allocation2 + $0x6] sm:$0x3] %v1798_v1  ;;  %s1449_s5 = sld [smem:[#allocation3 + $0x38]]  ;;  %vm436_vm8 = vcmask 261120   ;;  %vm450_vm9 = vcmask 416768   ;;  %vm588_vm10 = vcmask 408576  }
  0x34   : > { %s1458_s6 = sld [smem:[#allocation3 + $0x4d]]  ;;  %vm726_vm13 = vcmask 400384  }
  0x35   : > { %s1452_s7 = sld [smem:[#allocation3 + $0x3f]] }
  0x36   : > { %s1950_s8 = sld [smem:[#allocation3 + $0x23]]  ;;  %v365_v42 = vstv %s1945_s15 }
  0x37   : > { %s1461_s14 = sld [smem:[#allocation3 + $0x54]]  ;;  %v367_v43 = vstv %s1455_s20 }
  0x38   : > { %v179_v2 = vld.sshfl [vmem:[#allocation1] sm:$0xff pattern:$0x75316420]  ;;  %v180_v3 = vld.sshfl [vmem:[#allocation1 + $0x8] sm:$0xff pattern:$0x75316420]  ;;  %v327_v44 = vstv %s1448_s4 }
  0x39   : > { %v184_v4 = vsel %vm183_vm0, %v179_v2, 0.0  ;;  %v191_v5 = vsel %vm183_vm0, %v180_v3, 0.0  ;;  %200 = vst [vmem:[#allocation1] ss:$2 sm:$0xff] %v176_v0  ;;  %s1955_s17 = sld [smem:[#allocation3 + $0x1c]]  ;;  %v329_v45 = vstv %s1449_s5  ;;  %s1799_s4 = smov 80  }
  0x3a   : > { %v185_v6 = vrot.slane %v184_v4, 4  ;;  %v192_v7 = vrot.slane %v191_v5, 4  ;;  %s1957_s18 = sld [smem:[#allocation3 + $0xe]]  ;;  %v387_v46 = vstv %s1458_s6  ;;  %s1800_s5 = smov 112  }
  0x3b   : > { %s1959_s19 = sld [smem:[#allocation3 + $0x5b]]  ;;  %v348_v47 = vstv %s1452_s7 }
  0x3c   : > { %v186_v8 = vadd.f32 %v185_v6, %v184_v4  ;;  %v193_v9 = vadd.f32 %v192_v7, %v191_v5  ;;  %s1962_s22 = sld [smem:[#allocation3 + $0x2a]]  ;;  %v404_v50 = vstv %s1950_s8  ;;  %s1801_s8 = smov 48  }
  0x3d   : > { %s1964_s23 = sld [smem:[#allocation3 + $0x40]]  ;;  %v406_v51 = vstv %s1461_s14 }
  0x3e   : > { %v187_v10 = vrot.slane %v186_v8, 2  ;;  %v194_v11 = vrot.slane %v193_v9, 2  ;;  %s1971_s24 = sld [smem:[#allocation3 + $0x39]] }
  0x3f   : > { %v385_v56 = vstv %s1955_s17  ;;  %s1981_s28 = sld [smem:[#allocation3 + $0x47]] }
  0x40   : > { %v188_v12 = vadd.f32 %v187_v10, %v186_v8  ;;  %v195_v13 = vadd.f32 %v194_v11, %v193_v9  ;;  %v201_v14 = vld.sshfl [vmem:[#allocation1] sm:$0xff pattern:$0x75316420]  ;;  %v202_v15 = vld.sshfl [vmem:[#allocation1 + $0x8] sm:$0xff pattern:$0x75316420]  ;;  %v346_v58 = vstv %s1957_s18 }
  0x41   : > { %v205_v16 = vsel %vm183_vm0, %v201_v14, -inf  ;;  %v212_v17 = vsel %vm183_vm0, %v202_v15, -inf  ;;  %s1985_s30 = sld [smem:[#allocation3 + $0xf]]  ;;  %v425_v0 = vstv %s1959_s19 }
  0x42   : > { %v189_v18 = vrot.slane %v188_v12, 1  ;;  %v196_v19 = vrot.slane %v195_v13, 1  ;;  %v206_v20 = vrot.slane %v205_v16, 4  ;;  %v213_v21 = vrot.slane %v212_v17, 4  ;;  %s1987_s15 = sld [smem:[#allocation3 + $0x8]] }
  0x43   : > { %v423_v6 = vstv %s1962_s22  ;;  %s1993_s20 = sld [smem:[#allocation3 + $0x16]]  ;;  %v492_v11 = vstv %s1964_s23  ;;  %s1802_s22 = smov 64  }
  0x44   : > { %v190_v23 = vadd.f32 %v189_v18, %v188_v12  ;;  %v197_v24 = vadd.f32 %v196_v19, %v195_v13  ;;  %v207_v25 = vmax.f32 %v205_v16, %v206_v20  ;;  %v214_v26 = vmax.f32 %v212_v17, %v213_v21  ;;  %s1998_s6 = sld [smem:[#allocation3 + $0x55]]  ;;  %s1803_s23 = smov 96  }
  0x45   : > { %v474_v12 = vstv %s1971_s24  ;;  %s2002_s7 = sld [smem:[#allocation3 + $0x4e]]  ;;  %v510_v15 = vstv %s1981_s28 }
  0x46   : > { %v208_v27 = vrot.slane %v207_v25, 2  ;;  %v215_v28 = vrot.slane %v214_v26, 2  ;;  %v219_v29 = vmul.f32 0.25, %v190_v23  ;;  %v220_v30 = vmul.f32 0.25, %v197_v24  ;;  %s2007_s14 = sld [smem:[#allocation3 + $0x5c]] }
  0x47   : > { %s2011_s17 = sld [smem:[#allocation3 + $0x24]]  ;;  %v490_v20 = vstv %s1985_s30  ;;  %s1804_s30 = smov 32  }
  0x48   : > { %v209_v31 = vmax.f32 %v207_v25, %v208_v27  ;;  %v216_v32 = vmax.f32 %v214_v26, %v215_v28  ;;  %v225_v33 = vrot.slane %v220_v30, 7  ;;  %v472_v21 = vstv %s1987_s15  ;;  %s2015_s18 = sld [smem:[#allocation3 + $0x1d]] }
  0x49   : > { %v508_v25 = vstv %s1993_s20  ;;  %s2019_s19 = sld [smem:[#allocation3 + $0x2b]] }
  0x4a   : > { %v210_v35 = vrot.slane %v209_v31, 1  ;;  %v217_v36 = vrot.slane %v216_v32, 1  ;;  %v227_v37 = vsel %vm226_vm1, %v219_v29, %v225_v33  ;;  %s2025_s24 = sld [smem:[#allocation3 + $0x3a]]  ;;  %v546_v30 = vstv %s1998_s6 }
  0x4b   : > { %234 = vst.msk [vmem:[#allocation2 + $0x2] ss:$2 sm:$0x3] %vm1941_vm2, %v227_v37  ;;  %s2029_s28 = sld [smem:[#allocation3 + $0x3b]] }
  0x4c   : > { %v211_v38 = vmax.f32 %v209_v31, %v210_v35  ;;  %v218_v39 = vmax.f32 %v216_v32, %v217_v36  ;;  %v528_v31 = vstv %s2002_s7  ;;  %v564_v34 = vstv %s2007_s14  ;;  %s2034_s15 = sld [smem:[#allocation3 + $0x41]] }
  0x4d   : > { %s2038_s20 = sld [smem:[#allocation3 + $0x9]] }
  0x4e   : > { %v237_v40 = vrot.slane %v218_v39, 7  ;;  %v544_v39 = vstv %s2011_s17  ;;  %s2042_s6 = sld [smem:[#allocation3 + $0xa]] }
  0x4f   : > { %s2046_s7 = sld [smem:[#allocation3 + $0x10]] }
  0x50   : > { %v238_v41 = vsel %vm226_vm1, %v211_v38, %v237_v40  ;;  %v526_v40 = vstv %s2015_s18  ;;  %s2052_s14 = sld [smem:[#allocation3 + $0x48]] }
  0x51   : > { %241 = vst.msk [vmem:[#allocation2 + $0x3] ss:$2 sm:$0x3] %vm1941_vm2, %v238_v41  ;;  %s2056_s17 = sld [smem:[#allocation3 + $0x42]] }
  0x52   : > { %s2061_s18 = sld [smem:[#allocation3 + $0x3c]] }
  0x58   : > { %v1966_v48 = vld [vmem:[#allocation2] sm:$0x3f] }
  0x59   : > { %v1968_v49 = vld [vmem:[#allocation2 + $0x2] sm:$0x3f]  ;;  %v366_v52 = vmul.f32 %v365_v42, %v1966_v48  ;;  %v368_v53 = vmul.f32 %v367_v43, %v1966_v48  ;;  %v328_v54 = vmul.f32 %v327_v44, %v1966_v48  ;;  %v330_v55 = vmul.f32 %v329_v45, %v1966_v48 }
  0x5a   : > { %v388_v57 = vmul.f32 %v387_v46, %v1968_v49  ;;  %v349_v59 = vmul.f32 %v348_v47, %v1966_v48  ;;  %v405_v62 = vmul.f32 %v404_v50, %v1968_v49  ;;  %v407_v63 = vmul.f32 %v406_v51, %v1968_v49 }
  0x5b   : > { %v1456_v60 = vrot.slane %v368_v53, 9  ;;  %v1450_v61 = vrot.slane %v330_v55, 9  ;;  %v386_v4 = vmul.f32 %v385_v56, %v1968_v49  ;;  %v347_v5 = vmul.f32 %v346_v58, %v1966_v48 }
  0x5c   : > { %v1462_v3 = vrot.slane %v407_v63, 9  ;;  %v1459_v7 = vrot.slane %v388_v57, 9  ;;  %v1453_v8 = vrot.slane %v349_v59, 9  ;;  %v426_v10 = vmul.f32 %v425_v0, %v1968_v49 }
  0x5d   : > { %v373_v1 = vadd.f32 %v1456_v60, %v366_v52  ;;  %v335_v2 = vadd.f32 %v1450_v61, %v328_v54  ;;  %v424_v13 = vmul.f32 %v423_v6, %v1968_v49  ;;  %v493_v18 = vmul.f32 %v492_v11, %v1966_v48 }
  0x5e   : > { %v412_v9 = vadd.f32 %v1462_v3, %v405_v62  ;;  %v1465_v14 = vrot.slane %v426_v10, 9  ;;  %v393_v16 = vadd.f32 %v1459_v7, %v386_v4  ;;  %v354_v17 = vadd.f32 %v1453_v8, %v347_v5 }
  0x5f   : > { %375 = vrot.lane.b32.xlu1 %v373_v1, %s1799_s4  ;;  %337 = vrot.lane.b32.xlu0 %v335_v2, %s1800_s5  ;;  %v475_v19 = vmul.f32 %v474_v12, %v1966_v48  ;;  %v511_v24 = vmul.f32 %v510_v15, %v1966_v48  ;;  %v491_v26 = vmul.f32 %v490_v20, %v1966_v48  ;;  %v1474_v27 = vrot.slane %v493_v18, 9 }
  0x60   : > { %414 = vrot.lane.b32.xlu2 %v412_v9, %s1801_s8  ;;  %v431_v23 = vadd.f32 %v1465_v14, %v424_v13  ;;  %v473_v28 = vmul.f32 %v472_v21, %v1966_v48  ;;  %v509_v32 = vmul.f32 %v508_v25, %v1966_v48  ;;  %v547_v37 = vmul.f32 %v546_v30, %v1968_v49 }
  0x61   : > { %v1471_v29 = vrot.slane %v475_v19, 9  ;;  %v1477_v33 = vrot.slane %v511_v24, 9  ;;  %v498_v35 = vadd.f32 %v1474_v27, %v491_v26  ;;  %v529_v38 = vmul.f32 %v528_v31, %v1968_v49 }
  0x62   : > { %v565_v42 = vmul.f32 %v564_v34, %v1968_v49  ;;  %v562_v43 = vstv %s2019_s19  ;;  %v545_v44 = vmul.f32 %v544_v39, %v1968_v49  ;;  %v1483_v45 = vrot.slane %v547_v37, 9  ;;  %s2065_s19 = sld [smem:[#allocation3 + $0x17]] }
  0x63   : > { %v480_v36 = vadd.f32 %v1471_v29, %v473_v28  ;;  %v516_v41 = vadd.f32 %v1477_v33, %v509_v32  ;;  %v527_v46 = vmul.f32 %v526_v40, %v1968_v49  ;;  %v1480_v47 = vrot.slane %v529_v38, 9 }
  0x64   : > { %v612_v50 = vstv %s2025_s24  ;;  %v750_v51 = vstv %s2029_s28  ;;  %v563_v52 = vmul.f32 %v562_v43, %v1968_v49  ;;  %v1486_v53 = vrot.slane %v565_v42, 9  ;;  %s2069_s24 = sld [smem:[#allocation3 + $0x11]] }
  0x65   : > { %v630_v54 = vstv %s2034_s15  ;;  %v552_v55 = vadd.f32 %v1483_v45, %v545_v44  ;;  %v534_v56 = vadd.f32 %v1480_v47, %v527_v46  ;;  %v613_v57 = vmul.f32 %v612_v50, %v1966_v48  ;;  %s2073_s28 = sld [smem:[#allocation3 + $0xb]] }
  0x66   : > { %v751_v58 = vmul.f32 %v750_v51, %v1966_v48  ;;  %v610_v59 = vstv %s2038_s20  ;;  %v748_v60 = vstv %s2042_s6  ;;  %v570_v61 = vadd.f32 %v1486_v53, %v563_v52  ;;  %s2079_s15 = sld [smem:[#allocation3 + $0x4f]] }
  0x67   : > { %395 = vrot.lane.b32.xlu1 %v393_v16, %s1802_s22  ;;  %356 = vrot.lane.b32.xlu0 %v354_v17, %s1803_s23  ;;  %v631_v62 = vmul.f32 %v630_v54, %v1966_v48  ;;  %v628_v63 = vstv %s2046_s7  ;;  %v611_v0 = vmul.f32 %v610_v59, %v1966_v48  ;;  %v1492_v1 = vrot.slane %v613_v57, 9  ;;  %s2083_s20 = sld [smem:[#allocation3 + $0x3d]] }
  0x68   : > { %433 = vrot.lane.b32.xlu2 %v431_v23, %s1804_s30  ;;  %v749_v2 = vmul.f32 %v748_v60, %v1966_v48  ;;  %v1513_v3 = vrot.slane %v751_v58, 9  ;;  %v648_v4 = vstv %s2052_s14  ;;  %v768_v5 = vstv %s2056_s17  ;;  %s2088_s6 = sld [smem:[#allocation3 + $0x43]] }
  0x69   : > { %v629_v6 = vmul.f32 %v628_v63, %v1966_v48  ;;  %v1495_v7 = vrot.slane %v631_v62, 9  ;;  %v888_v8 = vstv %s2061_s18  ;;  %v618_v9 = vadd.f32 %v1492_v1, %v611_v0  ;;  %s2092_s7 = sld [smem:[#allocation3 + $0x1e]] }
  0x6a   : > { %v756_v10 = vadd.f32 %v1513_v3, %v749_v2  ;;  %v649_v11 = vmul.f32 %v648_v4, %v1966_v48  ;;  %v769_v12 = vmul.f32 %v768_v5, %v1966_v48  ;;  %v646_v13 = vstv %s2065_s19  ;;  %s2096_s14 = sld [smem:[#allocation3 + $0xc]] }
  0x6b   : > { %v766_v14 = vstv %s2069_s24  ;;  %v636_v15 = vadd.f32 %v1495_v7, %v629_v6  ;;  %v889_v16 = vmul.f32 %v888_v8, %v1966_v48  ;;  %v886_v17 = vstv %s2073_s28  ;;  %s2100_s17 = sld [smem:[#allocation3 + $0x12]] }
  0x6c   : > { %v647_v18 = vmul.f32 %v646_v13, %v1966_v48  ;;  %v1498_v19 = vrot.slane %v649_v11, 9  ;;  %v767_v20 = vmul.f32 %v766_v14, %v1966_v48  ;;  %v1516_v21 = vrot.slane %v769_v12, 9  ;;  %s2106_s18 = sld [smem:[#allocation3 + $0x49]] }
  0x6d   : > { %v666_v23 = vstv %s2079_s15  ;;  %v1026_v24 = vstv %s2083_s20  ;;  %s2110_s19 = sld [smem:[#allocation3 + $0x4a]]  ;;  %v887_v25 = vmul.f32 %v886_v17, %v1966_v48  ;;  %v1534_v26 = vrot.slane %v889_v16, 9 }
  0x6e   : > { %v906_v27 = vstv %s2088_s6  ;;  %s2115_s24 = sld [smem:[#allocation3 + $0x56]]  ;;  %v654_v28 = vadd.f32 %v1498_v19, %v647_v18  ;;  %v774_v29 = vadd.f32 %v1516_v21, %v767_v20  ;;  %v667_v30 = vmul.f32 %v666_v23, %v1968_v49 }
  0x6f   : > { %500 = vrot.lane.b32.xlu1 %v498_v35, %s1803_s23  ;;  %482 = vrot.lane.b32.xlu0 %v480_v36, %s1800_s5  ;;  %v1027_v31 = vmul.f32 %v1026_v24, %v1966_v48  ;;  %s2119_s28 = sld [smem:[#allocation3 + $0x18]]  ;;  %v664_v32 = vstv %s2092_s7  ;;  %v894_v34 = vadd.f32 %v1534_v26, %v887_v25  ;;  %v907_v35 = vmul.f32 %v906_v27, %v1966_v48 }
  0x70   : > { %518 = vrot.lane.b32.xlu2 %v516_v41, %s1799_s4  ;;  %v1024_v33 = vstv %s2096_s14  ;;  %s2123_s15 = sld [smem:[#allocation3 + $0x19]]  ;;  %v665_v37 = vmul.f32 %v664_v32, %v1968_v49  ;;  %v1501_v38 = vrot.slane %v667_v30, 9  ;;  %v782_v41 = vld [vmem:[#allocation2 + $0x2] sm:$0xf] }
  0x71   : > { %v904_v36 = vstv %s2100_s17  ;;  %s2127_s20 = sld [smem:[#allocation3 + $0x25]]  ;;  %v1025_v39 = vmul.f32 %v1024_v33, %v1966_v48  ;;  %v1555_v40 = vrot.slane %v1027_v31, 9  ;;  %v1537_v45 = vrot.slane %v907_v35, 9 }
  0x72   : > { %s2133_s6 = sld [smem:[#allocation3 + $0x44]]  ;;  %v787_v42 = vstv %s2106_s18  ;;  %v905_v44 = vmul.f32 %v904_v36, %v1966_v48  ;;  %v672_v47 = vadd.f32 %v1501_v38, %v665_v37 }
  0x73   : > { %v924_v43 = vstv %s2110_s19  ;;  %s2137_s7 = sld [smem:[#allocation3 + $0x50]]  ;;  %v1032_v50 = vadd.f32 %v1555_v40, %v1025_v39  ;;  %v788_v51 = vmul.f32 %v787_v42, %v782_v41 }
  0x74   : > { %v684_v46 = vstv %s2115_s24  ;;  %s2142_s14 = sld [smem:[#allocation3 + $0x3e]]  ;;  %v925_v52 = vmul.f32 %v924_v43, %v1968_v49 }
  0x75   : > { %s2145_s17 = sld [smem:[#allocation3 + $0x13]]  ;;  %v785_v53 = vstv %s2119_s28  ;;  %v1519_v59 = vrot.slane %v788_v51, 9 }
  0x76   : > { %v922_v54 = vstv %s2123_s15  ;;  %s2149_s18 = sld [smem:[#allocation3 + $0x1f]]  ;;  %v786_v58 = vmul.f32 %v785_v53, %v782_v41 }
  0x77   : > { %554 = vrot.lane.b32.xlu1 %v552_v55, %s1801_s8  ;;  %536 = vrot.lane.b32.xlu0 %v534_v56, %s1802_s22  ;;  %v912_v55 = vadd.f32 %v1537_v45, %v905_v44  ;;  %v685_v56 = vmul.f32 %v684_v46, %v1968_v49  ;;  %v682_v57 = vstv %s2127_s20  ;;  %s2153_s19 = sld [smem:[#allocation3 + $0xd]]  ;;  %v923_v60 = vmul.f32 %v922_v54, %v1968_v49 }
  0x78   : > { %572 = vrot.lane.b32.xlu2 %v570_v61, %s1804_s30  ;;  %v1540_v61 = vrot.slane %v925_v52, 9  ;;  %s2158_s24 = sld [smem:[#allocation3 + $0x5d]]  ;;  %v1044_v62 = vstv %s2133_s6  ;;  %v683_v0 = vmul.f32 %v682_v57, %v1968_v49  ;;  %v793_v3 = vadd.f32 %v1519_v59, %v786_v58 }
  0x79   : > { %v805_v63 = vstv %s2137_s7  ;;  %s2162_s28 = sld [smem:[#allocation3 + $0x4b]]  ;;  %v1504_v1 = vrot.slane %v685_v56, 9  ;;  %v1045_v5 = vmul.f32 %v1044_v62, %v1966_v48 }
  0x7a   : > { %v1164_v2 = vstv %s2142_s14  ;;  %s2167_s15 = sld [smem:[#allocation3 + $0x51]]  ;;  %v930_v4 = vadd.f32 %v1540_v61, %v923_v60  ;;  %v806_v6 = vmul.f32 %v805_v63, %v1968_v49 }
  0x7b   : > { %s2171_s20 = sld [smem:[#allocation3 + $0x2c]]  ;;  %v1042_v7 = vstv %s2145_s17  ;;  %v1558_v13 = vrot.slane %v1045_v5, 9 }
  0x7c   : > { %v803_v8 = vstv %s2149_s18  ;;  %s2175_s6 = sld [smem:[#allocation3 + $0x1a]]  ;;  %v1043_v12 = vmul.f32 %v1042_v7, %v1966_v48 }
  0x7d   : > { %v1162_v11 = vstv %s2153_s19  ;;  %s2179_s7 = sld [smem:[#allocation3 + $0x20]]  ;;  %v804_v14 = vmul.f32 %v803_v8, %v1968_v49 }
  0x7e   : > { %s2185_s14 = sld [smem:[#allocation3 + $0x45]]  ;;  %v702_v16 = vstv %s2158_s24  ;;  %v1163_v18 = vmul.f32 %v1162_v11, %v1966_v48  ;;  %v1050_v21 = vadd.f32 %v1558_v13, %v1043_v12 }
  0x7f   : > { %620 = vrot.lane.b32.xlu1 %v618_v9, %s1800_s5  ;;  %758 = vrot.lane.b32.xlu0 %v756_v10, %s1800_s5  ;;  %v690_v9 = vadd.f32 %v1504_v1, %v683_v0  ;;  %v1165_v10 = vmul.f32 %v1164_v2, %v1966_v48  ;;  %v1062_v17 = vstv %s2162_s28  ;;  %s2189_s17 = sld [smem:[#allocation3 + $0x58]]  ;;  %v703_v24 = vmul.f32 %v702_v16, %v1968_v49 }
  0x80   : > { %638 = vrot.lane.b32.xlu2 %v636_v15, %s1803_s23  ;;  %v1522_v15 = vrot.slane %v806_v6, 9  ;;  %v942_v20 = vstv %s2167_s15  ;;  %s2194_s18 = sld [smem:[#allocation3 + $0x57]]  ;;  %v1063_v25 = vmul.f32 %v1062_v17, %v1968_v49 }
  0x81   : > { %v1576_v19 = vrot.slane %v1165_v10, 9  ;;  %s2198_s19 = sld [smem:[#allocation3 + $0x14]]  ;;  %v700_v26 = vstv %s2171_s20  ;;  %v1507_v32 = vrot.slane %v703_v24, 9 }
  0x82   : > { %v811_v23 = vadd.f32 %v1522_v15, %v804_v14  ;;  %v1060_v27 = vstv %s2175_s6  ;;  %s2202_s24 = sld [smem:[#allocation3 + $0x27]]  ;;  %v701_v31 = vmul.f32 %v700_v26, %v1968_v49 }
  0x83   : > { %v940_v30 = vstv %s2179_s7  ;;  %s2206_s28 = sld [smem:[#allocation3 + $0x26]]  ;;  %v1061_v33 = vmul.f32 %v1060_v27, %v1968_v49 }
  0x84   : > { %s2212_s15 = sld [smem:[#allocation3 + $0x52]]  ;;  %v1182_v35 = vstv %s2185_s14  ;;  %v941_v37 = vmul.f32 %v940_v30, %v1968_v49  ;;  %v708_v40 = vadd.f32 %v1507_v32, %v701_v31 }
  0x85   : > { %v960_v36 = vstv %s2189_s17  ;;  %s2216_s20 = sld [smem:[#allocation3 + $0x5e]]  ;;  %v1183_v42 = vmul.f32 %v1182_v35, %v1966_v48 }
  0x86   : > { %v823_v39 = vstv %s2194_s18  ;;  %s2221_s6 = sld [smem:[#allocation3 + $0x4c]]  ;;  %v961_v43 = vmul.f32 %v960_v36, %v1968_v49 }
  0x87   : > { %656 = vrot.lane.b32.xlu1 %v654_v28, %s1799_s4  ;;  %776 = vrot.lane.b32.xlu0 %v774_v29, %s1803_s23  ;;  %v1170_v28 = vadd.f32 %v1576_v19, %v1163_v18  ;;  %v943_v29 = vmul.f32 %v942_v20, %v1968_v49  ;;  %s2225_s7 = sld [smem:[#allocation3 + $0x21]]  ;;  %v1180_v44 = vstv %s2198_s19  ;;  %v1579_v52 = vrot.slane %v1183_v42, 9 }
  0x88   : > { %896 = vrot.lane.b32.xlu2 %v894_v34, %s1800_s5  ;;  %v1561_v34 = vrot.slane %v1063_v25, 9  ;;  %v958_v45 = vstv %s2202_s24  ;;  %s2229_s14 = sld [smem:[#allocation3 + $0x2d]]  ;;  %v1181_v51 = vmul.f32 %v1180_v44, %v1966_v48  ;;  %v1546_v54 = vrot.slane %v961_v43, 9 }
  0x89   : > { %v1543_v38 = vrot.slane %v943_v29, 9  ;;  %v959_v53 = vmul.f32 %v958_v45, %v1968_v49  ;;  %s2239_s17 = sld [smem:[#allocation3 + $0x5f]] }
  0x8a   : > { %v1068_v41 = vadd.f32 %v1561_v34, %v1061_v33  ;;  %s2243_s18 = sld [smem:[#allocation3 + $0x53]]  ;;  %v1188_v60 = vadd.f32 %v1579_v52, %v1181_v51 }
  0x8b   : > { %v948_v46 = vadd.f32 %v1543_v38, %v941_v37  ;;  %v841_v56 = vstv %s2216_s20  ;;  %s2248_s19 = sld [smem:[#allocation3 + $0x59]]  ;;  %v966_v61 = vadd.f32 %v1546_v54, %v959_v53 }
  0x8c   : > { %v1200_v59 = vstv %s2221_s6  ;;  %v842_v63 = vmul.f32 %v841_v56, %v1968_v49  ;;  %s2252_s24 = sld [smem:[#allocation3 + $0x2e]] }
  0x8d   : > { %v1078_v0 = vstv %s2225_s7  ;;  %s2266_s20 = sld [smem:[#allocation3 + $0x60]] }
  0x8e   : > { %v839_v1 = vstv %s2229_s14  ;;  %v1079_v5 = vmul.f32 %v1078_v0, %v1968_v49  ;;  %v1528_v8 = vrot.slane %v842_v63, 9  ;;  %s2270_s6 = sld [smem:[#allocation3 + $0x61]] }
  0x8f   : > { %674 = vrot.lane.b32.xlu1 %v672_v47, %s1802_s22  ;;  %1034 = vrot.lane.b32.xlu0 %v1032_v50, %s1800_s5  ;;  %v824_v47 = vmul.f32 %v823_v39, %v1968_v49  ;;  %v821_v50 = vstv %s2206_s28  ;;  %s2256_s28 = sld [smem:[#allocation3 + $0x22]]  ;;  %v840_v7 = vmul.f32 %v839_v1, %v1968_v49 }
  0x90   : > { %914 = vrot.lane.b32.xlu2 %v912_v55, %s1803_s23  ;;  %v1080_v55 = vstv %s2212_s15  ;;  %v822_v57 = vmul.f32 %v821_v50, %v1968_v49  ;;  %s2260_s15 = sld [smem:[#allocation3 + $0x28]]  ;;  %v1218_v10 = vstv %s2243_s18 }
  0x91   : > { %v1525_v58 = vrot.slane %v824_v47, 9  ;;  %v1081_v62 = vmul.f32 %v1080_v55, %v1968_v49  ;;  %v1098_v13 = vstv %s2248_s19  ;;  %v847_v15 = vadd.f32 %v1528_v8, %v840_v7  ;;  %s2279_s7 = sld [smem:[#allocation3 + $0x2f]]  ;;  %s1806_s19 = smov 50  }
  0x92   : > { %v1219_v17 = vmul.f32 %v1218_v10, %v1968_v49  ;;  %v976_v18 = vstv %s2252_s24  ;;  %s2283_s14 = sld [smem:[#allocation3 + $0x30]] }
  0x93   : > { %v829_v2 = vadd.f32 %v1525_v58, %v822_v57  ;;  %v1564_v6 = vrot.slane %v1081_v62, 9  ;;  %v977_v24 = vmul.f32 %v976_v18, %v1968_v49  ;;  %s1466_s18 = sld [smem:[#allocation3 + $0x1]] }
  0x94   : > { %v1585_v27 = vrot.slane %v1219_v17, 9  ;;  %v1254_v29 = vstv %s2270_s6  ;;  %s1488_s24 = sld [smem:[#allocation3 + $0x33]] }
  0x95   : > { %v1086_v14 = vadd.f32 %v1564_v6, %v1079_v5  ;;  %v1216_v19 = vstv %s2256_s28  ;;  %v1255_v37 = vmul.f32 %v1254_v29, %v1968_v49  ;;  %s1487_s28 = sld [smem:[#allocation3 + $0x2]] }
  0x96   : > { %v1217_v26 = vmul.f32 %v1216_v19, %v1968_v49  ;;  %s1530_s6 = sld [smem:[#allocation3 + $0x35]] }
  0x97   : > { %795 = vrot.lane.b32.xlu1 %v793_v3, %s1799_s4  ;;  %932 = vrot.lane.b32.xlu0 %v930_v4, %s1799_s4  ;;  %v1201_v3 = vmul.f32 %v1200_v59, %v1968_v49  ;;  %v1114_v38 = vstv %s2279_s7  ;;  %s2369_s7 = sld [smem:[#allocation3 + $0x36]] }
  0x98   : > { %692 = vrot.lane.b32.xlu2 %v690_v9, %s1801_s8  ;;  %v978_v9 = vstv %s2239_s17  ;;  %v1224_v34 = vadd.f32 %v1585_v27, %v1217_v26  ;;  %v1252_v39 = vstv %s2283_s14  ;;  %v1115_v43 = vmul.f32 %v1114_v38, %v1968_v49  ;;  %s1467_s17 = sld [smem:[#allocation3 + $0x32]] }
  0x99   : > { %v1582_v12 = vrot.slane %v1201_v3, 9  ;;  %v979_v16 = vmul.f32 %v978_v9, %v1968_v49  ;;  %v1253_v45 = vmul.f32 %v1252_v39, %v1968_v49  ;;  %v461_v8 = vstv %s1466_s18  ;;  %s2372_s14 = sld [smem:[#allocation3 + $0x37]]  ;;  %s1810_s18 = smov 45  }
  0x9b   : > { %v1549_v25 = vrot.slane %v979_v16, 9 }
  0x9d   : > { %v984_v33 = vadd.f32 %v1549_v25, %v977_v24 }
  0x9e   : > { %v463_v0 = vstv %s1467_s17  ;;  %s1808_s17 = smov 47  }
  0x9f   : > { %1052 = vrot.lane.b32.xlu1 %v1050_v21, %s1803_s23  ;;  %813 = vrot.lane.b32.xlu0 %v811_v23, %s1802_s22  ;;  %v1099_v21 = vmul.f32 %v1098_v13, %v1968_v49  ;;  %v1096_v23 = vstv %s2260_s15  ;;  %v464_v5 = vmul.f32 %v463_v0, %v1966_v48  ;;  %v462_v13 = vmul.f32 %v461_v8, %v1966_v48  ;;  %s1509_s15 = sld [smem:[#allocation3 + $0x34]] }
  0xa0   : > { %1172 = vrot.lane.b32.xlu2 %v1170_v28, %s1800_s5  ;;  %s2233_s5 = sld [smem:[#allocation3 + $0x1b]]  ;;  %v1116_v28 = vstv %s2266_s20  ;;  %v1097_v30 = vmul.f32 %v1096_v23, %v1968_v49  ;;  %v601_v0 = vstv %s1488_s24 }
  0xa1   : > { %v1567_v31 = vrot.slane %v1099_v21, 9  ;;  %v1117_v36 = vmul.f32 %v1116_v28, %v1968_v49  ;;  %s1508_s20 = sld [smem:[#allocation3 + $0x3]] }
  0xa3   : > { %v1570_v44 = vrot.slane %v1117_v36, 9 }
  0xa5   : > { %v1122_v51 = vadd.f32 %v1570_v44, %v1115_v43 }
  0xa6   : > { %v1198_v4 = vstv %s2233_s5  ;;  %s2287_s5 = sld [smem:[#allocation3 + $0x29]] }
  0xa7   : > { %710 = vrot.lane.b32.xlu1 %v708_v40, %s1804_s30  ;;  %1070 = vrot.lane.b32.xlu0 %v1068_v41, %s1799_s4  ;;  %v1199_v11 = vmul.f32 %v1198_v4, %v1968_v49  ;;  %v1104_v40 = vadd.f32 %v1567_v31, %v1097_v30 }
  0xa8   : > { %950 = vrot.lane.b32.xlu2 %v948_v46, %s1802_s22  ;;  %v1591_v46 = vrot.slane %v1255_v37, 9 }
  0xa9   : > { %v1206_v20 = vadd.f32 %v1582_v12, %v1199_v11 }
  0xaa   : > { %v1260_v52 = vadd.f32 %v1591_v46, %v1253_v45 }
  0xac   : > { %v1234_v42 = vstv %s2287_s5  ;;  %s2378_s5 = sld [smem:[#allocation3 + $0x5]] }
  0xad   : > { %v1235_v47 = vmul.f32 %v1234_v42, %v1968_v49 }
  0xaf   : > { %1190 = vrot.lane.b32.xlu1 %v1188_v60, %s1803_s23  ;;  %968 = vrot.lane.b32.xlu0 %v966_v61, %s1801_s8  ;;  %s2275_s23 = sld [smem:[#allocation3 + $0x5a]] }
  0xb0   : > { %831 = vrot.lane.b32.xlu2 %v829_v2, %s1801_s8 }
  0xb5   : > { %v1236_v32 = vstv %s2275_s23  ;;  %s1529_s23 = sld [smem:[#allocation3 + $0x4]] }
  0xb6   : > { %v1237_v41 = vmul.f32 %v1236_v32, %v1968_v49 }
  0xb7   : > { %1088 = vrot.lane.b32.xlu1 %v1086_v14, %s1802_s22  ;;  %849 = vrot.lane.b32.xlu0 %v847_v15, %s1804_s30  ;;  %v1468_v14 = vrot.slane %v464_v5, 9 }
  0xb8   : > { %1208 = vrot.lane.b32.xlu2 %v1206_v20, %s1799_s4  ;;  %v1588_v50 = vrot.slane %v1237_v41, 9  ;;  %s1446_s4 = sld [smem:[#allocation3 + $0x31]] }
  0xb9   : > { %v469_v24 = vadd.f32 %v1468_v14, %v462_v13 }
  0xba   : > { %v2298_v35 = vpop.permute.xlu2 %414  ;;  %v1242_v54 = vadd.f32 %v1588_v50, %v1235_v47 }
  0xbb   : > { %v416_v15 = vrot.slane %v2298_v35, 6 }
  0xbd   : > { %v418_v26 = vsel %vm417_vm7, %v416_v15, %v2298_v35 }
  0xbe   : > { %v318_v56 = vstv %s1446_s4  ;;  %s2384_s4 = sld [smem:[#allocation3 + $0x6]] }
  0xbf   : > { %986 = vrot.lane.b32.xlu1 %v984_v33, %s1804_s30  ;;  %1226 = vrot.lane.b32.xlu0 %v1224_v34, %s1802_s22  ;;  %s314_s22 = sld [smem:[#allocation3]]  ;;  %v319_v57 = vmul.f32 %v318_v56, %v1966_v48 }
  0xc0   : > { %1106 = vrot.lane.b32.xlu2 %v1104_v40, %s1801_s8 }
  0xc1   : > { %v1447_v61 = vrot.slane %v319_v57, 9 }
  0xc2   : > { %v434_v53 = vpop.permute.xlu2 %433 }
  0xc3   : > { %v435_v19 = vrot.slane %v434_v53, 6 }
  0xc5   : > { %v316_v58 = vstv %s314_s22  ;;  %v437_v30 = vsel %vm436_vm8, %v435_v19, %v434_v53  ;;  %s1807_s22 = smov 49  }
  0xc6   : > { %v317_v60 = vmul.f32 %v316_v58, %v1966_v48 }
  0xc7   : > { %1124 = vrot.lane.b32.xlu1 %v1122_v51, %s1804_s30  ;;  %1262 = vrot.lane.b32.xlu0 %v1260_v52, %s1804_s30  ;;  %s1805_s30 = smov 51  }
  0xc8   : > { %1244 = vrot.lane.b32.xlu2 %v1242_v54, %s1801_s8  ;;  %v324_v1 = vadd.f32 %v1447_v61, %v317_v60 }
  0xca   : > { %v519_v55 = vpop.permute.xlu2 %518 }
  0xcb   : > { %v520_v31 = vrot.slane %v519_v55, 2 }
  0xcd   : > { %v521_v41 = vsel %vm378_vm5, %v519_v55, %v520_v31  ;;  %v877_v31 = vstv %s1530_s6 }
  0xd1   : > { %v376_v49 = vpop.permute.xlu1 %375  ;;  %v338_v59 = vpop.permute.xlu0 %337 }
  0xd2   : > { %v339_v62 = vrot.slane %v338_v59, 2  ;;  %v573_v63 = vpop.permute.xlu2 %572  ;;  %v377_v6 = vrot.slane %v376_v49, 2 }
  0xd3   : > { %v574_v44 = vrot.slane %v573_v63, 6 }
  0xd4   : > { %v341_v2 = vsel %vm340_vm3, %v338_v59, %v339_v62  ;;  %v379_v16 = vsel %vm378_vm5, %v376_v49, %v377_v6 }
  0xd5   : > { %v343_v9 = vadd.f32 %v341_v2, %v324_v1  ;;  %v575_v52 = vsel %vm436_vm8, %v574_v44, %v573_v63 }
  0xd9   : > { %v396_v3 = vpop.permute.xlu1 %395  ;;  %v357_v4 = vpop.permute.xlu0 %356 }
  0xda   : > { %v358_v7 = vrot.slane %v357_v4, 2  ;;  %v397_v10 = vrot.slane %v396_v3, 6  ;;  %v2323_v17 = vpop.permute.xlu2 %638 }
  0xdc   : > { %v360_v11 = vsel %vm359_vm4, %v357_v4, %v358_v7  ;;  %v399_v20 = vsel %vm398_vm6, %v397_v10, %v396_v3  ;;  %v602_v3 = vmul.f32 %v601_v0, %v1966_v48  ;;  %v599_v4 = vstv %s1487_s28 }
  0xdd   : > { %v362_v12 = vadd.f32 %v360_v11, %v343_v9  ;;  %v600_v6 = vmul.f32 %v599_v4, %v1966_v48  ;;  %v1015_v0 = vstv %s2369_s7 }
  0xde   : > { %v1489_v7 = vrot.slane %v602_v3, 9 }
  0xdf   : > { %v381_v18 = vadd.f32 %v379_v16, %v362_v12  ;;  %v640_v12 = vrot.slane %v2323_v17, 2 }
  0xe0   : > { %v607_v11 = vadd.f32 %v1489_v7, %v600_v6 }
  0xe1   : > { %v401_v21 = vadd.f32 %v399_v20, %v381_v18  ;;  %v501_v23 = vpop.permute.xlu1 %500  ;;  %v483_v25 = vpop.permute.xlu0 %482  ;;  %v641_v16 = vsel %vm359_vm4, %v2323_v17, %v640_v12 }
  0xe2   : > { %v502_v27 = vrot.slane %v501_v23, 2  ;;  %v484_v28 = vrot.slane %v483_v25, 2  ;;  %v2332_v42 = vpop.permute.xlu2 %896 }
  0xe3   : > { %v420_v29 = vadd.f32 %v418_v26, %v401_v21 }
  0xe4   : > { %v485_v32 = vsel %vm340_vm3, %v483_v25, %v484_v28  ;;  %v503_v36 = vsel %vm359_vm4, %v501_v23, %v502_v27  ;;  %v739_v23 = vstv %s1509_s15 }
  0xe5   : > { %v487_v33 = vadd.f32 %v485_v32, %v469_v24  ;;  %v439_v34 = vadd.f32 %v437_v30, %v420_v29  ;;  %v740_v28 = vmul.f32 %v739_v23, %v1966_v48  ;;  %v737_v30 = vstv %s1508_s20 }
  0xe7   : > { %v505_v37 = vadd.f32 %v503_v36, %v487_v33  ;;  %v443_v38 = vperm.slane %v439_v34, 4  ;;  %v442_v39 = vperm.slane %v439_v34, 2  ;;  %v441_v40 = vperm.slane %v439_v34, 0 }
  0xe8   : > { %v738_v33 = vmul.f32 %v737_v30, %v1966_v48  ;;  %v1510_v34 = vrot.slane %v740_v28, 9 }
  0xe9   : > { %v555_v35 = vpop.permute.xlu1 %554  ;;  %v537_v43 = vpop.permute.xlu0 %536  ;;  %448 = vrot.lane.b32.xlu2 %v443_v38, %s1805_s30  ;;  %446 = vrot.lane.b32.xlu1 %v442_v39, %s1805_s30  ;;  %v523_v47 = vadd.f32 %v521_v41, %v505_v37  ;;  %v878_v41 = vmul.f32 %v877_v31, %v1966_v48 }
  0xea   : > { %v556_v45 = vrot.slane %v555_v35, 6  ;;  %v538_v46 = vrot.slane %v537_v43, 6  ;;  %444 = vrot.lane.b32.xlu0 %v441_v40, %s1805_s30  ;;  %v2339_v58 = vpop.permute.xlu2 %914  ;;  %v875_v40 = vstv %s1529_s23  ;;  %s1445_s30 = sld [smem:[#allocation3 + $0x62]]  ;;  %s1336_s23 = scalar_lea.sflag [#allocation5], %s1923_s27 }
  0xec   : > { %v539_v50 = vsel %vm398_vm6, %v538_v46, %v537_v43  ;;  %v557_v53 = vsel %vm417_vm7, %v556_v45, %v555_v35  ;;  %v745_v46 = vadd.f32 %v1510_v34, %v738_v33 }
  0xed   : > { %v541_v51 = vadd.f32 %v539_v50, %v523_v47  ;;  %v1679_v50 = vld [vmem:[#allocation2] sm:$0x3f] }
  0xef   : > { %v559_v54 = vadd.f32 %v557_v53, %v541_v51  ;;  %v876_v51 = vmul.f32 %v1679_v50, %v875_v40  ;;  %v1531_v53 = vrot.slane %v878_v41, 9 }
  0xf1   : > { %v577_v55 = vadd.f32 %v575_v52, %v559_v54  ;;  %v621_v56 = vpop.permute.xlu1 %620  ;;  %v2337_v57 = vpop.permute.xlu0 %758  ;;  %v883_v3 = vadd.f32 %v1531_v53, %v876_v51 }
  0xf2   : > { %v693_v63 = vpop.permute.xlu2 %692  ;;  %v622_v8 = vrot.slane %v621_v56, 2  ;;  %v760_v38 = vrot.slane %v2337_v57, 2 }
  0xf3   : > { %v581_v49 = vperm.slane %v577_v55, 4  ;;  %v580_v59 = vperm.slane %v577_v55, 2  ;;  %v579_v60 = vperm.slane %v577_v55, 0  ;;  %v694_v26 = vrot.slane %v693_v63, 6 }
  0xf4   : > { %v623_v13 = vsel %vm340_vm3, %v621_v56, %v622_v8  ;;  %v761_v52 = vsel %vm340_vm3, %v2337_v57, %v760_v38  ;;  %v916_v8 = vrot.slane %v2339_v58, 2 }
  0xf5   : > { %586 = vrot.lane.b32.xlu2 %v581_v49, %s1806_s19  ;;  %584 = vrot.lane.b32.xlu1 %v580_v59, %s1806_s19  ;;  %v625_v15 = vadd.f32 %v623_v13, %v607_v11  ;;  %v695_v32 = vsel %vm417_vm7, %v694_v26, %v693_v63  ;;  %v898_v49 = vrot.slane %v2332_v42, 2  ;;  %v1016_v13 = vmul.f32 %v1679_v50, %v1015_v0 }
  0xf6   : > { %582 = vrot.lane.b32.xlu0 %v579_v60, %s1806_s19  ;;  %s1600_s19 = sshll.u32 %s1847_s13, 3  ;;  %s175_s13 = scalar_lea.vmem [#allocation8], %s1443_s29 }
  0xf7   : > { %v643_v25 = vadd.f32 %v641_v16, %v625_v15  ;;  %v899_v7 = vsel %vm340_vm3, %v2332_v42, %v898_v49  ;;  %v1013_v15 = vstv %s2378_s5  ;;  %s1347_s15 = scalar_lea.hbm %s2497_s2, %s1600_s19  ;;  %s1349_s20 = sshll.u32 %s175_s13, 4  ;;  %s1350_s20 = int_to_ptr.vmem [resolvable:$true] %s1349_s20 }
  0xf8   : > { %v901_v16 = vadd.f32 %v899_v7, %v883_v3  ;;  %v1014_v42 = vmul.f32 %v1679_v50, %v1013_v15  ;;  %s1351_s6 = sshll.u32 %s1347_s15, 4  ;;  %s1745_s29 = scalar_lea.hbm %s2497_s2, 16  ;;  %s1352_s6 = int_to_ptr.hbm [resolvable:$true] %s1351_s6 }
  0xf9   : > { %v657_v61 = vpop.permute.xlu1 %656  ;;  %v2341_v62 = vpop.permute.xlu0 %776  ;;  %s1739_s7 = sshra.s32 %s1352_s6, 4  ;;  %s1740_s7 = int_to_ptr.hbm [resolvable:$true] %s1739_s7 }
  0xfa   : > { %v2346_v5 = vpop.permute.xlu2 %1172  ;;  %v658_v14 = vrot.slane %v657_v61, 2  ;;  %v778_v44 = vrot.slane %v2341_v62, 2  ;;  %p1746_p9 = scmp.lt.s32.totalorder %s1740_s7, %s2497_s2 }
  0xfc   : > { %v659_v24 = vsel %vm378_vm5, %v657_v61, %v658_v14  ;;  %v779_v59 = vsel %vm359_vm4, %v2341_v62, %v778_v44  ;;  %v763_v61 = vadd.f32 %v761_v52, %v745_v46  ;;  %v1153_v62 = vstv %s2372_s14  ;;  %s1741_s14 = scalar_lea.hbm %s1740_s7, 8 }
  0xfd   : > { %v661_v29 = vadd.f32 %v659_v24, %v643_v25  ;;  %v917_v24 = vsel %vm359_vm4, %v2339_v58, %v916_v8  ;;  %v1151_v25 = vstv %s2384_s4  ;;  %v1174_v58 = vrot.slane %v2346_v5, 2  ;;  %p1742_p1 = scmp.ne.s32.totalorder %s1740_s7, %s1741_s14  ;;  %p1747_p10 = scmp.lt.s32.totalorder %s1745_s29, %s1741_s14 }
  0xfe   : > { %v781_v4 = vadd.f32 %v779_v59, %v763_v61  ;;  %v1152_v33 = vmul.f32 %v1679_v50, %v1151_v25 }
  0xff   : > { %p1743_p4 = pnand %p1742_p1, %p1892_p3  ;;  %p1748_p2 = por %p1747_p10, %p1746_p9 }
 0x101   : > { %v675_v1 = vpop.permute.xlu1 %674  ;;  %v2343_v2 = vpop.permute.xlu0 %1034  ;;  %p1744_p8 = pneg %p1743_p4 }
 0x102   : > { %v676_v18 = vrot.slane %v675_v1, 6  ;;  %v2357_v19 = vpop.permute.xlu2 %950 }
 0x103   : > { %p1749_p11 = pnand %p1748_p2, %p1744_p8 }
 0x104   : > { %v677_v27 = vsel %vm398_vm6, %v676_v18, %v675_v1  ;;  %v1154_v18 = vmul.f32 %v1679_v50, %v1153_v62 }
 0x105   : > { %v679_v17 = vadd.f32 %v677_v27, %v661_v29  ;;  %v1552_v27 = vrot.slane %v1016_v13, 9 }
 0x106   : > { %v1573_v34 = vrot.slane %v1154_v18, 9 }
 0x107   : > { %v697_v43 = vadd.f32 %v695_v32, %v679_v17  ;;  %v952_v17 = vrot.slane %v2357_v19, 6  ;;  %v919_v32 = vadd.f32 %v917_v24, %v901_v16  ;;  %v1021_v41 = vadd.f32 %v1552_v27, %v1014_v42 }
 0x109   : > { %v2349_v9 = vpop.permute.xlu1 %795  ;;  %v2351_v10 = vpop.permute.xlu0 %932 }
 0x10a   : > { %v832_v35 = vpop.permute.xlu2 %831  ;;  %v797_v48 = vrot.slane %v2349_v9, 6 }
 0x10b   : > { %v833_v12 = vrot.slane %v832_v35, 6 }
 0x10c   : > { %v798_v1 = vsel %vm378_vm5, %v797_v48, %v2349_v9  ;;  %v934_v9 = vrot.slane %v2351_v10, 6  ;;  %v1175_v48 = vsel %vm340_vm3, %v2346_v5, %v1174_v58 }
 0x10d   : > { %v800_v14 = vadd.f32 %v798_v1, %v781_v4  ;;  %v834_v26 = vsel %vm417_vm7, %v833_v12, %v832_v35 }
 0x10e   : > { %v935_v30 = vsel %vm378_vm5, %v934_v9, %v2351_v10 }
 0x10f   : > { %v937_v35 = vadd.f32 %v935_v30, %v919_v32 }
 0x111   : > { %v2359_v20 = vpop.permute.xlu1 %1052  ;;  %v814_v21 = vpop.permute.xlu0 %813 }
 0x112   : > { %v815_v60 = vrot.slane %v814_v21, 6  ;;  %v2392_v6 = vpop.permute.xlu2 %1208  ;;  %v1054_v38 = vrot.slane %v2359_v20, 2 }
 0x114   : > { %v816_v11 = vsel %vm398_vm6, %v815_v60, %v814_v21  ;;  %v1036_v21 = vrot.slane %v2343_v2, 2  ;;  %v1055_v53 = vsel %vm359_vm4, %v2359_v20, %v1054_v38 }
 0x115   : > { %v818_v23 = vadd.f32 %v816_v11, %v800_v14 }
 0x116   : > { %v1037_v10 = vsel %vm340_vm3, %v2343_v2, %v1036_v21  ;;  %vm1002_vm3 = vcmask 384000  }
 0x117   : > { %v1039_v2 = vadd.f32 %v1037_v10, %v1021_v41 }
 0x119   : > { %v711_v36 = vpop.permute.xlu1 %710  ;;  %v2366_v37 = vpop.permute.xlu0 %1070  ;;  %v1057_v5 = vadd.f32 %v1055_v53, %v1039_v2 }
 0x11a   : > { %v712_v39 = vrot.slane %v711_v36, 6  ;;  %v1107_v44 = vpop.permute.xlu2 %1106  ;;  %v1072_v46 = vrot.slane %v2366_v37, 6 }
 0x11b   : > { %v1108_v3 = vrot.slane %v1107_v44, 6 }
 0x11c   : > { %v713_v45 = vsel %vm436_vm8, %v712_v39, %v711_v36  ;;  %v836_v36 = vadd.f32 %v834_v26, %v818_v23  ;;  %v1073_v59 = vsel %vm378_vm5, %v1072_v46, %v2366_v37 }
 0x11d   : > { %v715_v47 = vadd.f32 %v713_v45, %v697_v43  ;;  %v953_v45 = vsel %vm398_vm6, %v952_v17, %v2357_v19  ;;  %v1075_v62 = vadd.f32 %v1073_v59, %v1057_v5  ;;  %v1109_v9 = vsel %vm417_vm7, %v1108_v3, %v1107_v44 }
 0x11f   : > { %v717_v54 = vperm.slane %v715_v47, 0  ;;  %v719_v55 = vperm.slane %v715_v47, 4  ;;  %v718_v56 = vperm.slane %v715_v47, 2  ;;  %v1159_v47 = vadd.f32 %v1573_v34, %v1152_v33 }
 0x121   : > { %v2386_v57 = vpop.permute.xlu1 %1190  ;;  %v969_v63 = vpop.permute.xlu0 %968  ;;  %720 = vrot.lane.b32.xlu2 %v717_v54, %s1807_s22  ;;  %724 = vrot.lane.b32.xlu1 %v719_v55, %s1807_s22  ;;  %v1177_v61 = vadd.f32 %v1175_v48, %v1159_v47 }
 0x122   : > { %722 = vrot.lane.b32.xlu0 %v718_v56, %s1807_s22  ;;  %v970_v39 = vrot.slane %v969_v63, 6  ;;  %v1192_v50 = vrot.slane %v2386_v57, 2  ;;  %v955_v56 = vadd.f32 %v953_v45, %v937_v35  ;;  %v1245_v37 = vpop.permute.xlu2 %1244 }
 0x123   : > { %v1246_v24 = vrot.slane %v1245_v37, 6 }
 0x124   : > { %v971_v54 = vsel %vm417_vm7, %v970_v39, %v969_v63  ;;  %v1193_v20 = vsel %vm359_vm4, %v2386_v57, %v1192_v50  ;;  %v1210_v63 = vrot.slane %v2392_v6, 6  ;;  %vm1140_vm4 = vcmask 375808  }
 0x125   : > { %v973_v0 = vadd.f32 %v971_v54, %v955_v56  ;;  %v1195_v8 = vadd.f32 %v1193_v20, %v1177_v61  ;;  %v1247_v21 = vsel %vm417_vm7, %v1246_v24, %v1245_v37 }
 0x126   : > { %v1211_v57 = vsel %vm378_vm5, %v1210_v63, %v2392_v6 }
 0x127   : > { %v1213_v26 = vadd.f32 %v1211_v57, %v1195_v8 }
 0x129   : > { %v1089_v28 = vpop.permute.xlu1 %1088  ;;  %v850_v29 = vpop.permute.xlu0 %849 }
 0x12a   : > { %v851_v31 = vrot.slane %v850_v29, 6  ;;  %v1090_v55 = vrot.slane %v1089_v28, 6 }
 0x12c   : > { %v852_v40 = vsel %vm436_vm8, %v851_v31, %v850_v29  ;;  %v1091_v1 = vsel %vm398_vm6, %v1090_v55, %v1089_v28 }
 0x12d   : > { %v854_v43 = vadd.f32 %v852_v40, %v836_v36  ;;  %v1093_v12 = vadd.f32 %v1091_v1, %v1075_v62 }
 0x12f   : > { %v858_v51 = vperm.slane %v854_v43, 4  ;;  %v857_v52 = vperm.slane %v854_v43, 2  ;;  %v856_v14 = vperm.slane %v854_v43, 0  ;;  %v1111_v42 = vadd.f32 %v1109_v9, %v1093_v12 }
 0x131   : > { %v987_v49 = vpop.permute.xlu1 %986  ;;  %v1227_v19 = vpop.permute.xlu0 %1226  ;;  %863 = vrot.lane.b32.xlu1 %v858_v51, %s1801_s8  ;;  %861 = vrot.lane.b32.xlu0 %v857_v52, %s1801_s8  ;;  %v243_v51 = vand.u32 127, %v229_v22 }
 0x132   : > { %v988_v60 = vrot.slane %v987_v49, 6  ;;  %v1228_v11 = vrot.slane %v1227_v19, 6 }
 0x133   : > { %v244_v48 = vadd.s32 128, %v243_v51  ;;  %v2440_v54 = vand.u32 15, %v243_v51 }
 0x134   : > { %v989_v4 = vsel %vm436_vm8, %v988_v60, %v987_v49  ;;  %v1229_v23 = vsel %vm398_vm6, %v1228_v11, %v1227_v19  ;;  %v312_v60 = vstv %s1445_s30 }
 0x135   : > { %v991_v7 = vadd.f32 %v989_v4, %v973_v0  ;;  %v1231_v29 = vadd.f32 %v1229_v23, %v1213_v26  ;;  %v2442_v55 = vand.u32 15, %v244_v48  ;;  %vm269_vm11 = vcmp.ge.s32.totalorder %v2440_v54, 3 }
 0x136   : > { %vm275_vm14 = vcmp.ge.s32.totalorder %v2440_v54, 2  ;;  %vm281_vm1 = vcmp.ge.s32.totalorder %v2440_v54, 1  ;;  %vm295_vm5 = vcmp.lt.s32.totalorder %v2440_v54, 15 }
 0x137   : > { %v994_v13 = vperm.slane %v991_v7, 2  ;;  %v995_v15 = vperm.slane %v991_v7, 4  ;;  %v993_v30 = vperm.slane %v991_v7, 0  ;;  %v1249_v33 = vadd.f32 %v1247_v21, %v1231_v29 }
 0x138   : > { %vm270_vm12 = vcmp.ge.s32.totalorder %v2442_v55, 3  ;;  %vm276_vm15 = vcmp.ge.s32.totalorder %v2442_v55, 2  ;;  %vm282_vm2 = vcmp.ge.s32.totalorder %v2442_v55, 1  ;;  %vm296_vm6 = vcmp.lt.s32.totalorder %v2442_v55, 15 }
 0x139   : > { %v1125_v16 = vpop.permute.xlu1 %1124  ;;  %v1263_v18 = vpop.permute.xlu0 %1262  ;;  %998 = vrot.lane.b32.xlu2 %v994_v13, %s1808_s17  ;;  %859 = vrot.lane.b32.xlu1 %v856_v14, %s1801_s8  ;;  %s1809_s8 = smov 46  }
 0x13a   : > { %v1126_v25 = vrot.slane %v1125_v16, 6  ;;  %1000 = vrot.lane.b32.xlu0 %v995_v15, %s1808_s17  ;;  %v1264_v28 = vrot.slane %v1263_v18, 6 }
 0x13c   : > { %v1127_v27 = vsel %vm436_vm8, %v1126_v25, %v1125_v16  ;;  %v1265_v32 = vsel %vm436_vm8, %v1264_v28, %v1263_v18  ;;  %vm301_vm8 = vcmp.lt.s32.totalorder %v2440_v54, 14 }
 0x13d   : > { %v1129_v6 = vadd.f32 %v1127_v27, %v1111_v42  ;;  %v1267_v34 = vadd.f32 %v1265_v32, %v1249_v33 }
 0x13f   : > { %v1133_v17 = vperm.slane %v1129_v6, 4  ;;  %v1132_v31 = vperm.slane %v1129_v6, 2  ;;  %v1131_v36 = vperm.slane %v1129_v6, 0  ;;  %v1271_v58 = vperm.slane %v1267_v34, 4 }
 0x140   : > { %v1270_v38 = vperm.slane %v1267_v34, 2  ;;  %v1269_v39 = vperm.slane %v1267_v34, 0 }
 0x141   : > { %996 = vrot.lane.b32.xlu2 %v993_v30, %s1808_s17  ;;  %1138 = vrot.lane.b32.xlu1 %v1133_v17, %s1809_s8 }
 0x142   : > { %1136 = vrot.lane.b32.xlu0 %v1132_v31, %s1809_s8 }
 0x143   : > { %v449_v40 = vpop.permute.xlu2 %448 }
 0x149   : > { %1134 = vrot.lane.b32.xlu2 %v1131_v36, %s1809_s8  ;;  %1276 = vrot.lane.b32.xlu1 %v1271_v58, %s1810_s18 }
 0x14a   : > { %1274 = vrot.lane.b32.xlu0 %v1270_v38, %s1810_s18 }
 0x14f   : > { %v587_v43 = vpop.permute.xlu2 %586 }
 0x151   : > { %1272 = vrot.lane.b32.xlu2 %v1269_v39, %s1810_s18 }
 0x15b   : > { %v447_v41 = vpop.permute.xlu1 %446 }
 0x15c   : > { %v445_v35 = vpop.permute.xlu0 %444  ;;  %v452_v19 = vsel %vm450_vm9, %v447_v41, %v449_v40 }
 0x15d   : > { %v451_v56 = vsel %vm450_vm9, %v445_v35, %v447_v41  ;;  %v456_v20 = vsel %vm270_vm12, %v452_v19, 0.0  ;;  %vm302_vm9 = vcmp.lt.s32.totalorder %v2442_v55, 14 }
 0x15e   : > { %v455_v61 = vsel %vm269_vm11, %v451_v56, 0.0  ;;  %v458_v62 = vadd.f32 %v456_v20, %v312_v60  ;;  %vm307_vm11 = vcmp.lt.s32.totalorder %v2440_v54, 13 }
 0x15f   : > { %v457_v3 = vadd.f32 %v455_v61, %v312_v60 }
 0x167   : > { %v585_v44 = vpop.permute.xlu1 %584 }
 0x168   : > { %v583_v10 = vpop.permute.xlu0 %582  ;;  %v590_v5 = vsel %vm588_vm10, %v585_v44, %v587_v43 }
 0x169   : > { %v589_v59 = vsel %vm588_vm10, %v583_v10, %v585_v44  ;;  %v594_v4 = vsel %vm276_vm15, %v590_v5, 0.0  ;;  %vm1278_vm10 = vcmask 367616  }
 0x16a   : > { %v593_v63 = vsel %vm275_vm14, %v589_v59, 0.0  ;;  %v596_v13 = vadd.f32 %v594_v4, %v458_v62  ;;  %v1327_v4 = vld [vmem:[%s1929_s3] sm:$0xff] }
 0x16b   : > { %v595_v11 = vadd.f32 %v593_v63, %v457_v3 }
 0x17b   : > { %v721_v45 = vpop.permute.xlu2 %720 }
 0x193   : > { %v725_v46 = vpop.permute.xlu1 %724  ;;  %v999_v50 = vpop.permute.xlu2 %998 }
 0x194   : > { %v723_v47 = vpop.permute.xlu0 %722 }
 0x195   : > { %v727_v0 = vsel %vm726_vm13, %v721_v45, %v723_v47  ;;  %v728_v1 = vsel %vm726_vm13, %v723_v47, %v725_v46 }
 0x196   : > { %v731_v7 = vsel %vm281_vm1, %v727_v0, 0.0  ;;  %v732_v12 = vsel %vm282_vm2, %v728_v1, 0.0 }
 0x197   : > { %v733_v57 = vadd.f32 %v731_v7, %v595_v11  ;;  %v734_v16 = vadd.f32 %v732_v12, %v596_v13 }
 0x19b   : > { %v997_v2 = vpop.permute.xlu2 %996 }
 0x19c   : > { %v1003_v23 = vsel %vm1002_vm3, %v997_v2, %v999_v50 }
 0x19d   : > { %v1007_v28 = vsel %vm295_vm5, %v1003_v23, 0.0 }
 0x1a3   : > { %v864_v52 = vpop.permute.xlu1 %863  ;;  %v862_v53 = vpop.permute.xlu0 %861 }
 0x1a4   : > { %v1135_v8 = vpop.permute.xlu2 %1134  ;;  %v866_v18 = vsel %vm417_vm7, %v862_v53, %v864_v52 }
 0x1a5   : > { %v872_v27 = vadd.f32 %v866_v18, %v734_v16 }
 0x1ab   : > { %v860_v49 = vpop.permute.xlu1 %859 }
 0x1ac   : > { %v1001_v22 = vpop.permute.xlu0 %1000  ;;  %v865_v14 = vsel %vm417_vm7, %v860_v49, %v862_v53  ;;  %vm308_vm7 = vcmp.lt.s32.totalorder %v2442_v55, 13  ;;  %v1273_v31 = vpop.permute.xlu2 %1272 }
 0x1ad   : > { %v1004_v9 = vsel %vm1002_vm3, %v999_v50, %v1001_v22  ;;  %v871_v24 = vadd.f32 %v865_v14, %v733_v57 }
 0x1ae   : > { %v1008_v42 = vsel %vm296_vm6, %v1004_v9, 0.0 }
 0x1af   : > { %v1009_v21 = vadd.f32 %v1007_v28, %v871_v24  ;;  %v1010_v30 = vadd.f32 %v1008_v42, %v872_v27 }
 0x1b3   : > { %v1139_v37 = vpop.permute.xlu1 %1138 }
 0x1b4   : > { %v1137_v15 = vpop.permute.xlu0 %1136 }
 0x1b5   : > { %v1141_v25 = vsel %vm1140_vm4, %v1135_v8, %v1137_v15  ;;  %v1142_v26 = vsel %vm1140_vm4, %v1137_v15, %v1139_v37 }
 0x1b6   : > { %v1145_v29 = vsel %vm301_vm8, %v1141_v25, 0.0  ;;  %v1146_v6 = vsel %vm302_vm9, %v1142_v26, 0.0 }
 0x1b7   : > { %v1147_v33 = vadd.f32 %v1145_v29, %v1009_v21  ;;  %v1148_v34 = vadd.f32 %v1146_v6, %v1010_v30 }
 0x1bb   : > { %v1277_v17 = vpop.permute.xlu1 %1276 }
 0x1bc   : > { %v1275_v32 = vpop.permute.xlu0 %1274 }
 0x1bd   : > { %v1279_v36 = vsel %vm1278_vm10, %v1273_v31, %v1275_v32  ;;  %v1280_v58 = vsel %vm1278_vm10, %v1275_v32, %v1277_v17 }
 0x1be   : > { %v1283_v38 = vsel %vm307_vm11, %v1279_v36, 0.0  ;;  %v1284_v39 = vsel %vm308_vm7, %v1280_v58, 0.0 }
 0x1bf   : > { %v1285_v40 = vadd.f32 %v1283_v38, %v1147_v33  ;;  %v1286_v41 = vadd.f32 %v1284_v39, %v1148_v34 }
 0x1c1   : > { %v1592_v35 = vmul.f32 -1.442695, %v1285_v40  ;;  %v1593_v43 = vmul.f32 -1.442695, %v1286_v41 }
 0x1c3   : > { %1671 = vpow2.f32 %v1592_v35 }
 0x1c4   : > { %1673 = vpow2.f32 %v1593_v43 }
 0x1c9   : > { %v1672_v44 = vpop.eup %1671 }
 0x1ca   : > { %v1674_v10 = vpop.eup %1673  ;;  %v1293_v45 = vadd.f32 1.0, %v1672_v44 }
 0x1cb   : > { %v1294_v46 = vadd.f32 1.0, %v1674_v10 }
 0x1cc   : > { %1675 = vrcp.f32 %v1293_v45  ;;  %v1306_v55 = vand.u32 2147483648, %v1293_v45  ;;  %v1304_v56 = vand.u32 2147483647, %v1293_v45  ;;  %vm1300_vm14 = vweird.f32 %v1293_v45 }
 0x1cd   : > { %1677 = vrcp.f32 %v1294_v46  ;;  %v1321_v2 = vand.u32 2147483648, %v1294_v46  ;;  %v1319_v19 = vand.u32 2147483647, %v1294_v46  ;;  %vm1315_vm1 = vweird.f32 %v1294_v46 }
 0x1ce   : > { %v1307_v61 = vor.u32 1.1754944e-38, %v1306_v55  ;;  %vm1305_vm3 = vcmp.eq.f32.partialorder %v1304_v56, 8.507059e+37 }
 0x1cf   : > { %v1322_v5 = vor.u32 1.1754944e-38, %v1321_v2  ;;  %vm1320_vm4 = vcmp.eq.f32.partialorder %v1319_v19, 8.507059e+37 }
 0x1d2   : > { %v1676_v47 = vpop.eup %1675 }
 0x1d3   : > { %v1678_v50 = vpop.eup %1677  ;;  %v1296_v51 = vmul.f32 %v1676_v47, %v1293_v45  ;;  %vm1301_vm12 = vweird.f32 %v1676_v47 }
 0x1d4   : > { %v1311_v52 = vmul.f32 %v1678_v50, %v1294_v46  ;;  %vm1316_vm13 = vweird.f32 %v1678_v50  ;;  %vm1302_vm15 = vmor %vm1300_vm14, %vm1301_vm12 }
 0x1d5   : > { %v1297_v48 = vsub.f32 1.0, %v1296_v51  ;;  %vm1317_vm2 = vmor %vm1315_vm1, %vm1316_vm13 }
 0x1d6   : > { %v1312_v53 = vsub.f32 1.0, %v1311_v52 }
 0x1d7   : > { %v1298_v54 = vmul.f32 %v1676_v47, %v1297_v48 }
 0x1d8   : > { %v1313_v49 = vmul.f32 %v1678_v50, %v1312_v53 }
 0x1d9   : > { %v1299_v22 = vadd.f32 %v1676_v47, %v1298_v54 }
 0x1da   : > { %v1314_v59 = vadd.f32 %v1678_v50, %v1313_v49 }
 0x1db   : > { %v1303_v60 = vsel %vm1302_vm15, %v1676_v47, %v1299_v22 }
 0x1dc   : > { %v1318_v20 = vsel %vm1317_vm2, %v1678_v50, %v1314_v59  ;;  %v1308_v0 = vsel %vm1305_vm3, %v1307_v61, %v1303_v60 }
 0x1dd   : > { %v1323_v63 = vsel %vm1320_vm4, %v1322_v5, %v1318_v20  ;;  %v1325_v3 = vperm.slane %v1308_v0, 0 }
 0x1de   : > { %v1326_v1 = vperm.slane %v1323_v63, 0 }
 0x1e0   : > { %v1330_v62 = vrot.slane %v1326_v1, 4 }
 0x1e2   : > { %v1331_v7 = vsel %vm183_vm0, %v1325_v3, %v1330_v62 }
 0x1e3   : > { %v1333_v8 = vmul.f32 %v1331_v7, %v1327_v4 }
 0x1e5   : > { %1334 = vst [vmem:[%s175_s13] sm:$0xff] %v1333_v8 }
 0x1e6   : > { %1752 = shalt.err (!%p1749_p11)
}
 0x1e7   : > { %1607 = dma.vmem_to_hbm [thread:$0]  (%p1892_p3), %s1350_s20, 128, %s1352_s6, %s1336_s23  }
 0x1e8 PF: > { %s1363_s27 = sand.u32 1, %s1783_s9   ;;  %p2505_p12 = scmp.ge.s32.totalorder %s1795_s12, 2 }
 0x1e9   : > { %s1364_s17 = scalar_lea.sflag [#allocation5], %s1363_s27 }
 0x1ea   : > { %p1618_p13 = pnand %p2505_p12, %p1861_p6 }
 0x1ec   : > { %p1619_p0 = pneg %p1618_p13 }
 0x1ee   : > { %1778 = dma.done.wait (%p1619_p0), %s1364_s17, 128  }
 0x1ef   : > { %1780 = vsyncadd (%p1619_p0), %s1364_s17, 4294967168  ;;  %p16_p5 = scmp.ge.s32.totalorder %s1877_s21, 4   ;;  %s2506_s9 = smov %s1787_s10 }
 0x1f0   : > { %s2507_s10 = smov %s1791_s11  ;;  %s2508_s11 = smov %s1887_s25 }
 0x1f1   : > { %s2509_s12 = smov %s1877_s21  ;;  %18 = sbr.rel (!%p16_p5) target bundleno = 6 (0x6), region = 80 }
 0x1f6   :  { %1370 = vsyncpa [#allocation4], 1 }
 0x1f7   :  { %1372 = vsyncpa [#allocation4 + $0x1], 1 }
 0x1f8   :  { %1373 = vsyncpa [#allocation5], 1 }
 0x1f9   :  { %1375 = vsyncpa [#allocation5 + $0x1], 1 }
 0x1fa   :  { %1376 = vsyncpa [#allocation6], 1 }
 0x1fb   :  { %1378 = vsyncpa [#allocation6 + $0x1], 1 }

</bundles_post_ra>
